<compile_context>
chip_gen: v7x
topology: tpu7x:2x2x1
jax: 0.10.0
libtpu: 0.0.40
codegen_flags: <defaults>
</compile_context>

<pallas_src>
import functools
import math

import jax
import jax.numpy as jnp
from jax import lax
from jax.experimental import pallas as pl
from jax.experimental.pallas import tpu as pltpu  # noqa: F401

LANE = 128   # lane-padded feature width
SUB = 8      # sublane-padded row count multiple


# ------------------------------- Pallas kernel -------------------------------

def _encoder_kernel(x_ref, w_in_ref, b_in_ref,
                    w_qkv_ref, b_qkv_ref, w_o_ref, b_o_ref,
                    g1_ref, be1_ref, w1_ref, b1_ref, w2_ref, b2_ref,
                    g2_ref, be2_ref,
                    o_ref, *, nblocks, nhead, d_model, head_dim, seq_len, eps):
    npad, lane_w = x_ref.shape
    inv_d = 1.0 / float(d_model)
    bf16 = jnp.bfloat16

    # ---- hoisted constants (computed once per invocation) ----
    lane_full = lax.broadcasted_iota(jnp.int32, (npad, lane_w), 1)
    feat_mask = (lane_full < d_model).astype(jnp.float32)        # live feature lanes

    lane_d = lax.broadcasted_iota(jnp.int32, (npad, d_model), 1)
    head_masks = [(lane_d >= h * head_dim) & (lane_d < (h + 1) * head_dim)
                  for h in range(nhead)]

    # Key mask for padded sequence rows (they carry b_in garbage after in_layer;
    # they must never contribute as attention keys). Skipped iff seq_len == npad.
    if seq_len != npad:
        col_ids = lax.broadcasted_iota(jnp.int32, (npad, npad), 1)
        neg_bias = jnp.where(col_ids < seq_len, 0.0, -1e30)
    else:
        neg_bias = None

    def mxu(a, b):
        # bf16 MXU inputs, f32 accumulation
        return jnp.dot(a.astype(bf16), b.astype(bf16),
                       preferred_element_type=jnp.float32)

    def mxu_nt(a, b):
        # a @ b.T (contract last dims) with bf16 inputs, f32 accumulation
        return lax.dot_general(a.astype(bf16), b.astype(bf16),
                               (((1,), (1,)), ((), ())),
                               preferred_element_type=jnp.float32)

    def layer_norm(v, g, b):
        # v has exactly-zero padded lanes, so the mean over 128 lanes is exact.
        mean = jnp.sum(v, axis=-1, keepdims=True) * inv_d
        c = (v - mean) * feat_mask          # two-pass variance; mask padded lanes
        var = jnp.sum(c * c, axis=-1, keepdims=True) * inv_d
        return c * lax.rsqrt(var + eps) * g + b   # padded lanes stay exactly zero

    # ---- in_layer (the Dropout that follows is identity in eval mode) ----
    x = mxu(x_ref[...], w_in_ref[...]) + b_in_ref[...]

    for blk in range(nblocks):
        # ----- fused QKV projection: ONE (npad,128)x(128,128) matmul -----
        # lanes [0:d]=Q (1/sqrt(dh) folded in), [d:2d]=K, [2d:3d]=V, rest zero
        qkv = mxu(x, w_qkv_ref[blk]) + b_qkv_ref[blk]
        q_blk = qkv[:, 0:d_model]
        k_blk = qkv[:, d_model:2 * d_model]
        v_blk = qkv[:, 2 * d_model:3 * d_model]

        # ----- per-head attention, contexts accumulated head-major in 'ctx' -----
        ctx = jnp.zeros((npad, d_model), jnp.float32)
        for h in range(nhead):
            m = head_masks[h]
            q_h = jnp.where(m, q_blk, 0.0)
            k_h = jnp.where(m, k_blk, 0.0)
            v_h = jnp.where(m, v_blk, 0.0)
            s = mxu_nt(q_h, k_h)                           # (npad, npad), f32
            if neg_bias is not None:
                s = s + neg_bias
            s = s - jnp.max(s, axis=-1, keepdims=True)     # softmax in f32
            p = jnp.exp(s)
            p = p * pl.reciprocal(jnp.sum(p, axis=-1, keepdims=True), approx=True)
            ctx = ctx + mxu(p, v_h)                        # head h lands in its lanes

        # ----- fused output projection: ONE matmul for all heads -----
        attn = mxu(ctx, w_o_ref[blk][:d_model, :]) + b_o_ref[blk]
        x = layer_norm(x + attn, g1_ref[blk], be1_ref[blk])

        # ----- feed-forward (Linear -> ReLU -> Linear) -----
        h1 = jnp.maximum(mxu(x, w1_ref[blk]) + b1_ref[blk], 0.0)
        h2 = mxu(h1, w2_ref[blk]) + b2_ref[blk]
        x = layer_norm(x + h2, g2_ref[blk], be2_ref[blk])

    o_ref[...] = x


# -------------------------------- JAX wrapper ---------------------------------

def _full_spec(shape):
    # whole-array block (no grid; everything fits comfortably in VMEM)
    return pl.BlockSpec(shape, lambda: tuple(0 for _ in shape))


def transformer_forward(padded_params, x, cfg, eps=1e-5):
    d = cfg['model_hidden']
    in_features = cfg['window_size'] * 3
    assert 3 * d <= LANE and in_features <= LANE
    x2 = x.reshape(-1, in_features).astype(jnp.float32)
    n = x2.shape[0]
    n_pad = max(SUB, ((n + SUB - 1) // SUB) * SUB)
    x_pad = jnp.zeros((n_pad, LANE), jnp.float32).at[:n, :in_features].set(x2)

    args = (x_pad,) + tuple(padded_params)
    kernel = functools.partial(
        _encoder_kernel,
        nblocks=cfg['model_nblocks'],
        nhead=cfg['model_nhead'],
        d_model=d,
        head_dim=d // cfg['model_nhead'],
        seq_len=n,
        eps=eps)

    out = pl.pallas_call(
        kernel,
        out_shape=jax.ShapeDtypeStruct((n_pad, LANE), jnp.float32),
        in_specs=[_full_spec(a.shape) for a in args],
        out_specs=_full_spec((n_pad, LANE)),
    )(*args)
    return out[:n, :d]


# ------------------------- parameter init & preparation -----------------------

def init_params(key, cfg):
    """Deterministic parameters mirroring the PyTorch module's shapes."""
    in_features = cfg['window_size'] * 3
    d = cfg['model_hidden']
    nblocks = cfg['model_nblocks']

    def linear_init(k, fan_in, fan_out):
        kw, kb = jax.random.split(k)
        bound = 1.0 / math.sqrt(fan_in)
        w = jax.random.uniform(kw, (fan_out, fan_in), jnp.float32, -bound, bound)
        b = jax.random.uniform(kb, (fan_out,), jnp.float32, -bound, bound)
        return w, b

    keys = jax.random.split(key, 1 + nblocks)
    params = {'in_layer': linear_init(keys[0], in_features, d), 'layers': []}
    for i in range(nblocks):
        ks = jax.random.split(keys[1 + i], 10)
        w_qkv = 0.3 * jax.random.normal(ks[0], (3 * d, d), jnp.float32)   # in_proj_weight
        b_qkv = 0.1 * jax.random.normal(ks[1], (3 * d,), jnp.float32)     # in_proj_bias
        w_o, b_o = linear_init(ks[2], d, d)                               # out_proj
        w_1, b_1 = linear_init(ks[3], d, d)                               # linear1 (ff = d)
        w_2, b_2 = linear_init(ks[4], d, d)                               # linear2
        g_1 = 1.0 + 0.1 * jax.random.normal(ks[5], (d,), jnp.float32)     # norm1
        b_n1 = 0.1 * jax.random.normal(ks[6], (d,), jnp.float32)
        g_2 = 1.0 + 0.1 * jax.random.normal(ks[7], (d,), jnp.float32)     # norm2
        b_n2 = 0.1 * jax.random.normal(ks[8], (d,), jnp.float32)
        params['layers'].append((w_qkv, b_qkv, w_o, b_o, w_1, b_1, w_2, b_2,
                                 g_1, b_n1, g_2, b_n2))
    return params


def _pad2d(a, rows, cols):
    out = jnp.zeros((rows, cols), jnp.float32)
    return out.at[:a.shape[0], :a.shape[1]].set(a)


def _pad_row(a, cols):
    return _pad2d(a.reshape(1, -1), 1, cols)


def prepare_padded_params(params, cfg):
    """One-time prep (outside jit): transpose, fuse QKV per block, fold the softmax
    scale into W_q/b_q, zero-pad to 128 lanes, cast weights to bf16, stack."""
    d = cfg['model_hidden']
    H = cfg['model_nhead']
    dh = d // H
    scale = 1.0 / math.sqrt(float(dh))
    bf16 = jnp.bfloat16

    w_in, b_in = params['in_layer']
    w_in_p = _pad2d(w_in.T, LANE, LANE).astype(bf16)
    b_in_p = _pad_row(b_in, LANE)

    wqkv, bqkv, wo, bo = [], [], [], []
    g1, be1, w1, b1, w2, b2, g2, be2 = [], [], [], [], [], [], [], []
    for (w_qkv, b_qkv, w_o, b_o, w_1, b_1, w_2, b_2,
         g_1, b_n1, g_2, b_n2) in params['layers']:
        # Packed QKV weight: lanes [0:d]=Q (scaled), [d:2d]=K, [2d:3d]=V.
        w_pack = jnp.zeros((LANE, LANE), jnp.float32)
        w_pack = w_pack.at[:d, 0:d].set(w_qkv[:d].T * scale)
        w_pack = w_pack.at[:d, d:2 * d].set(w_qkv[d:2 * d].T)
        w_pack = w_pack.at[:d, 2 * d:3 * d].set(w_qkv[2 * d:].T)
        wqkv.append(w_pack.astype(bf16))
        b_pack = jnp.zeros((1, LANE), jnp.float32)
        b_pack = b_pack.at[0, 0:d].set(b_qkv[:d] * scale)
        b_pack = b_pack.at[0, d:2 * d].set(b_qkv[d:2 * d])
        b_pack = b_pack.at[0, 2 * d:3 * d].set(b_qkv[2 * d:])
        bqkv.append(b_pack)

        wo.append(_pad2d(w_o.T, LANE, LANE).astype(bf16))   # rows = head-major ctx dims
        bo.append(_pad_row(b_o, LANE))
        g1.append(_pad_row(g_1, LANE)); be1.append(_pad_row(b_n1, LANE))
        w1.append(_pad2d(w_1.T, LANE, LANE).astype(bf16)); b1.append(_pad_row(b_1, LANE))
        w2.append(_pad2d(w_2.T, LANE, LANE).astype(bf16)); b2.append(_pad_row(b_2, LANE))
        g2.append(_pad_row(g_2, LANE)); be2.append(_pad_row(b_n2, LANE))

    stk = lambda xs: jnp.stack(xs, axis=0)
    return (w_in_p, b_in_p,
            stk(wqkv), stk(bqkv), stk(wo), stk(bo),
            stk(g1), stk(be1), stk(w1), stk(b1), stk(w2), stk(b2),
            stk(g2), stk(be2))


# ------------------------------ pure-JAX reference ----------------------------

def transformer_forward_ref(params, x, cfg, eps=1e-5):
    d = cfg['model_hidden']
    H = cfg['model_nhead']
    dh = d // H
    in_features = cfg['window_size'] * 3
    xx = x.reshape(-1, in_features).astype(jnp.float32)
    n = xx.shape[0]

    def ln(v, g, b):
        m = jnp.mean(v, axis=-1, keepdims=True)
        var = jnp.mean((v - m) ** 2, axis=-1, keepdims=True)
        return (v - m) / jnp.sqrt(var + eps) * g + b

    w_in, b_in = params['in_layer']
    xx = xx @ w_in.T + b_in
    for (w_qkv, b_qkv, w_o, b_o, w_1, b_1, w_2, b_2,
         g_1, b_n1, g_2, b_n2) in params['layers']:
        q = xx @ w_qkv[:d].T + b_qkv[:d]
        k = xx @ w_qkv[d:2 * d].T + b_qkv[d:2 * d]
        v = xx @ w_qkv[2 * d:].T + b_qkv[2 * d:]
        qh = q.reshape(n, H, dh).transpose(1, 0, 2)
        kh = k.reshape(n, H, dh).transpose(1, 0, 2)
        vh = v.reshape(n, H, dh).transpose(1, 0, 2)
        s = jnp.einsum('hqd,hkd->hqk', qh, kh) / math.sqrt(dh)
        p = jax.nn.softmax(s, axis=-1)
        ctx = jnp.einsum('hqk,hkd->hqd', p, vh).transpose(1, 0, 2).reshape(n, d)
        attn = ctx @ w_o.T + b_o
        xx = ln(xx + attn, g_1, b_n1)
        h1 = jnp.maximum(xx @ w_1.T + b_1, 0.0)
        h2 = h1 @ w_2.T + b_2
        xx = ln(xx + h2, g_2, b_n2)
    return xx


# ------------------------------------ main ------------------------------------

if __name__ == "__main__":
    cfg = {
        'window_size': 8,       # in_features = 24
        'model_hidden': 32,
        'model_nblocks': 2,
        'model_nhead': 4,
        'model_dropout': 0.1,   # identity in eval mode
    }

    key = jax.random.PRNGKey(0)
    kp, kx = jax.random.split(key)
    params = init_params(kp, cfg)
    padded = prepare_padded_params(params, cfg)   # one-time prep, outside jit

    batch = 4
    x = jax.random.normal(kx, (batch, cfg['window_size'], 3), jnp.float32)

    fwd = jax.jit(lambda pp, xi: transformer_forward(pp, xi, cfg))
    out = jax.block_until_ready(fwd(padded, x))

    ref = transformer_forward_ref(params, x, cfg)
    assert out.shape == (batch, cfg['model_hidden']), out.shape
    max_err = float(jnp.max(jnp.abs(out - ref)))
    # bf16 MXU inputs (vs the f32 reference) give ~1e-2 typical deviation at these
    # magnitudes; 5e-2 bounds the worst case while still catching structural bugs.
    assert max_err < 5e-2, max_err

    print("KERNEL_OK")
</pallas_src>

<mosaic_0001>
module attributes {stable_mosaic.version = 11 : i64} {
  func.func @_encoder_kernel(%arg0: memref<8x128xf32, #tpu.memory_space<vmem>>, %arg1: memref<128x128xbf16, #tpu.memory_space<vmem>>, %arg2: memref<1x128xf32, #tpu.memory_space<vmem>>, %arg3: memref<2x128x128xbf16, #tpu.memory_space<vmem>>, %arg4: memref<2x1x128xf32, #tpu.memory_space<vmem>>, %arg5: memref<2x128x128xbf16, #tpu.memory_space<vmem>>, %arg6: memref<2x1x128xf32, #tpu.memory_space<vmem>>, %arg7: memref<2x1x128xf32, #tpu.memory_space<vmem>>, %arg8: memref<2x1x128xf32, #tpu.memory_space<vmem>>, %arg9: memref<2x128x128xbf16, #tpu.memory_space<vmem>>, %arg10: memref<2x1x128xf32, #tpu.memory_space<vmem>>, %arg11: memref<2x128x128xbf16, #tpu.memory_space<vmem>>, %arg12: memref<2x1x128xf32, #tpu.memory_space<vmem>>, %arg13: memref<2x1x128xf32, #tpu.memory_space<vmem>>, %arg14: memref<2x1x128xf32, #tpu.memory_space<vmem>>, %arg15: memref<8x128xf32, #tpu.memory_space<vmem>>) attributes {dimension_semantics = [], scalar_prefetch = 0 : i64, scratch_operands = 0 : i64, tpu.core_type = #tpu.core_type<tc>} {
    %0 = tpu.iota {dimensions = array<i32: 1>} : vector<8x128xi32>
    %c32_i32 = arith.constant 32 : i32
    %1 = vector.broadcast %c32_i32 : i32 to vector<8x128xi32>
    %2 = arith.cmpi slt, %0, %1 : vector<8x128xi32>
    %3 = arith.extui %2 : vector<8x128xi1> to vector<8x128xi32>
    %4 = arith.sitofp %3 : vector<8x128xi32> to vector<8x128xf32>
    %5 = tpu.iota {dimensions = array<i32: 1>} : vector<8x32xi32>
    %c0_i32 = arith.constant 0 : i32
    %6 = vector.broadcast %c0_i32 : i32 to vector<8x32xi32>
    %7 = arith.cmpi sge, %5, %6 : vector<8x32xi32>
    %c8_i32 = arith.constant 8 : i32
    %8 = vector.broadcast %c8_i32 : i32 to vector<8x32xi32>
    %9 = arith.cmpi slt, %5, %8 : vector<8x32xi32>
    %10 = arith.andi %7, %9 : vector<8x32xi1>
    %c8_i32_0 = arith.constant 8 : i32
    %11 = vector.broadcast %c8_i32_0 : i32 to vector<8x32xi32>
    %12 = arith.cmpi sge, %5, %11 : vector<8x32xi32>
    %c16_i32 = arith.constant 16 : i32
    %13 = vector.broadcast %c16_i32 : i32 to vector<8x32xi32>
    %14 = arith.cmpi slt, %5, %13 : vector<8x32xi32>
    %15 = arith.andi %12, %14 : vector<8x32xi1>
    %c16_i32_1 = arith.constant 16 : i32
    %16 = vector.broadcast %c16_i32_1 : i32 to vector<8x32xi32>
    %17 = arith.cmpi sge, %5, %16 : vector<8x32xi32>
    %c24_i32 = arith.constant 24 : i32
    %18 = vector.broadcast %c24_i32 : i32 to vector<8x32xi32>
    %19 = arith.cmpi slt, %5, %18 : vector<8x32xi32>
    %20 = arith.andi %17, %19 : vector<8x32xi1>
    %c24_i32_2 = arith.constant 24 : i32
    %21 = vector.broadcast %c24_i32_2 : i32 to vector<8x32xi32>
    %22 = arith.cmpi sge, %5, %21 : vector<8x32xi32>
    %c32_i32_3 = arith.constant 32 : i32
    %23 = vector.broadcast %c32_i32_3 : i32 to vector<8x32xi32>
    %24 = arith.cmpi slt, %5, %23 : vector<8x32xi32>
    %25 = arith.andi %22, %24 : vector<8x32xi1>
    %26 = tpu.iota {dimensions = array<i32: 1>} : vector<8x8xi32>
    %c4_i32 = arith.constant 4 : i32
    %27 = vector.broadcast %c4_i32 : i32 to vector<8x8xi32>
    %28 = arith.cmpi slt, %26, %27 : vector<8x8xi32>
    %cst = arith.constant 0.000000e+00 : f32
    %cst_4 = arith.constant -1.000000e+30 : f32
    %29 = vector.broadcast %cst : f32 to vector<8x8xf32>
    %30 = vector.broadcast %cst_4 : f32 to vector<8x8xf32>
    %31 = arith.select %28, %29, %30 : vector<8x8xi1>, vector<8x8xf32>
    %c0 = arith.constant 0 : index
    %c0_5 = arith.constant 0 : index
    %32 = vector.load %arg0[%c0, %c0_5] : memref<8x128xf32, #tpu.memory_space<vmem>>, vector<8x128xf32>
    %c0_6 = arith.constant 0 : index
    %c0_7 = arith.constant 0 : index
    %33 = vector.load %arg1[%c0_6, %c0_7] : memref<128x128xbf16, #tpu.memory_space<vmem>>, vector<128x128xbf16>
    %34 = arith.truncf %32 : vector<8x128xf32> to vector<8x128xbf16>
    %cst_8 = arith.constant dense<0.000000e+00> : vector<8x128xf32>
    %35 = tpu.matmul %34, %33, %cst_8 {dimension_numbers = #tpu.dot_dimension_numbers<[1], [0], [0], [1], [0, 0, 1, 1], [], []>} : vector<8x128xbf16>, vector<128x128xbf16>, vector<8x128xf32> -> vector<8x128xf32>
    %c0_9 = arith.constant 0 : index
    %c0_10 = arith.constant 0 : index
    %36 = vector.load %arg2[%c0_9, %c0_10] : memref<1x128xf32, #tpu.memory_space<vmem>>, vector<1x128xf32>
    %37 = vector.broadcast %36 : vector<1x128xf32> to vector<8x128xf32>
    %38 = arith.addf %35, %37 : vector<8x128xf32>
    %c0_11 = arith.constant 0 : index
    %c0_12 = arith.constant 0 : index
    %c0_13 = arith.constant 0 : index
    %39 = vector.load %arg3[%c0_11, %c0_12, %c0_13] : memref<2x128x128xbf16, #tpu.memory_space<vmem>>, vector<1x128x128xbf16>
    %40 = vector.shape_cast %39 : vector<1x128x128xbf16> to vector<128x128xbf16>
    %41 = arith.truncf %38 : vector<8x128xf32> to vector<8x128xbf16>
    %cst_14 = arith.constant dense<0.000000e+00> : vector<8x128xf32>
    %42 = tpu.matmul %41, %40, %cst_14 {dimension_numbers = #tpu.dot_dimension_numbers<[1], [0], [0], [1], [0, 0, 1, 1], [], []>} : vector<8x128xbf16>, vector<128x128xbf16>, vector<8x128xf32> -> vector<8x128xf32>
    %c0_15 = arith.constant 0 : index
    %c0_16 = arith.constant 0 : index
    %c0_17 = arith.constant 0 : index
    %43 = vector.load %arg4[%c0_15, %c0_16, %c0_17] : memref<2x1x128xf32, #tpu.memory_space<vmem>>, vector<1x1x128xf32>
    %44 = vector.shape_cast %43 : vector<1x1x128xf32> to vector<1x128xf32>
    %45 = vector.broadcast %44 : vector<1x128xf32> to vector<8x128xf32>
    %46 = arith.addf %42, %45 : vector<8x128xf32>
    %47 = vector.extract_strided_slice %46 {offsets = [0, 0], sizes = [8, 32], strides = [1, 1]} : vector<8x128xf32> to vector<8x32xf32>
    %48 = vector.extract_strided_slice %46 {offsets = [0, 32], sizes = [8, 32], strides = [1, 1]} : vector<8x128xf32> to vector<8x32xf32>
    %49 = vector.extract_strided_slice %46 {offsets = [0, 64], sizes = [8, 32], strides = [1, 1]} : vector<8x128xf32> to vector<8x32xf32>
    %cst_18 = arith.constant 0.000000e+00 : f32
    %50 = vector.broadcast %cst_18 : f32 to vector<8x32xf32>
    %cst_19 = arith.constant 0.000000e+00 : f32
    %51 = vector.broadcast %cst_19 : f32 to vector<8x32xf32>
    %52 = arith.select %10, %47, %51 : vector<8x32xi1>, vector<8x32xf32>
    %cst_20 = arith.constant 0.000000e+00 : f32
    %53 = vector.broadcast %cst_20 : f32 to vector<8x32xf32>
    %54 = arith.select %10, %48, %53 : vector<8x32xi1>, vector<8x32xf32>
    %cst_21 = arith.constant 0.000000e+00 : f32
    %55 = vector.broadcast %cst_21 : f32 to vector<8x32xf32>
    %56 = arith.select %10, %49, %55 : vector<8x32xi1>, vector<8x32xf32>
    %57 = arith.truncf %52 : vector<8x32xf32> to vector<8x32xbf16>
    %58 = arith.truncf %54 : vector<8x32xf32> to vector<8x32xbf16>
    %cst_22 = arith.constant dense<0.000000e+00> : vector<8x8xf32>
    %59 = tpu.matmul %57, %58, %cst_22 {dimension_numbers = #tpu.dot_dimension_numbers<[1], [1], [0], [0], [0, 0, 1, 0], [], []>} : vector<8x32xbf16>, vector<8x32xbf16>, vector<8x8xf32> -> vector<8x8xf32>
    %60 = arith.addf %59, %31 : vector<8x8xf32>
    %cst_23 = arith.constant dense<0xFF800000> : vector<8xf32>
    %61 = vector.multi_reduction <maximumf>, %60, %cst_23 [1] : vector<8x8xf32> to vector<8xf32>
    %62 = vector.shape_cast %61 : vector<8xf32> to vector<8x1xf32>
    %63 = vector.broadcast %62 : vector<8x1xf32> to vector<8x8xf32>
    %64 = arith.subf %60, %63 : vector<8x8xf32>
    %65 = math.exp %64 : vector<8x8xf32>
    %cst_24 = arith.constant dense<0.000000e+00> : vector<8xf32>
    %66 = vector.multi_reduction <add>, %65, %cst_24 [1] : vector<8x8xf32> to vector<8xf32>
    %67 = vector.shape_cast %66 : vector<8xf32> to vector<8x1xf32>
    %68 = tpu.reciprocal %67 {approx = true} : vector<8x1xf32> -> vector<8x1xf32>
    %69 = vector.broadcast %68 : vector<8x1xf32> to vector<8x8xf32>
    %70 = arith.mulf %65, %69 : vector<8x8xf32>
    %71 = arith.truncf %70 : vector<8x8xf32> to vector<8x8xbf16>
    %72 = arith.truncf %56 : vector<8x32xf32> to vector<8x32xbf16>
    %cst_25 = arith.constant dense<0.000000e+00> : vector<8x32xf32>
    %73 = tpu.matmul %71, %72, %cst_25 {dimension_numbers = #tpu.dot_dimension_numbers<[1], [0], [0], [1], [0, 0, 1, 1], [], []>} : vector<8x8xbf16>, vector<8x32xbf16>, vector<8x32xf32> -> vector<8x32xf32>
    %74 = arith.addf %50, %73 : vector<8x32xf32>
    %cst_26 = arith.constant 0.000000e+00 : f32
    %75 = vector.broadcast %cst_26 : f32 to vector<8x32xf32>
    %76 = arith.select %15, %47, %75 : vector<8x32xi1>, vector<8x32xf32>
    %cst_27 = arith.constant 0.000000e+00 : f32
    %77 = vector.broadcast %cst_27 : f32 to vector<8x32xf32>
    %78 = arith.select %15, %48, %77 : vector<8x32xi1>, vector<8x32xf32>
    %cst_28 = arith.constant 0.000000e+00 : f32
    %79 = vector.broadcast %cst_28 : f32 to vector<8x32xf32>
    %80 = arith.select %15, %49, %79 : vector<8x32xi1>, vector<8x32xf32>
    %81 = arith.truncf %76 : vector<8x32xf32> to vector<8x32xbf16>
    %82 = arith.truncf %78 : vector<8x32xf32> to vector<8x32xbf16>
    %cst_29 = arith.constant dense<0.000000e+00> : vector<8x8xf32>
    %83 = tpu.matmul %81, %82, %cst_29 {dimension_numbers = #tpu.dot_dimension_numbers<[1], [1], [0], [0], [0, 0, 1, 0], [], []>} : vector<8x32xbf16>, vector<8x32xbf16>, vector<8x8xf32> -> vector<8x8xf32>
    %84 = arith.addf %83, %31 : vector<8x8xf32>
    %cst_30 = arith.constant dense<0xFF800000> : vector<8xf32>
    %85 = vector.multi_reduction <maximumf>, %84, %cst_30 [1] : vector<8x8xf32> to vector<8xf32>
    %86 = vector.shape_cast %85 : vector<8xf32> to vector<8x1xf32>
    %87 = vector.broadcast %86 : vector<8x1xf32> to vector<8x8xf32>
    %88 = arith.subf %84, %87 : vector<8x8xf32>
    %89 = math.exp %88 : vector<8x8xf32>
    %cst_31 = arith.constant dense<0.000000e+00> : vector<8xf32>
    %90 = vector.multi_reduction <add>, %89, %cst_31 [1] : vector<8x8xf32> to vector<8xf32>
    %91 = vector.shape_cast %90 : vector<8xf32> to vector<8x1xf32>
    %92 = tpu.reciprocal %91 {approx = true} : vector<8x1xf32> -> vector<8x1xf32>
    %93 = vector.broadcast %92 : vector<8x1xf32> to vector<8x8xf32>
    %94 = arith.mulf %89, %93 : vector<8x8xf32>
    %95 = arith.truncf %94 : vector<8x8xf32> to vector<8x8xbf16>
    %96 = arith.truncf %80 : vector<8x32xf32> to vector<8x32xbf16>
    %cst_32 = arith.constant dense<0.000000e+00> : vector<8x32xf32>
    %97 = tpu.matmul %95, %96, %cst_32 {dimension_numbers = #tpu.dot_dimension_numbers<[1], [0], [0], [1], [0, 0, 1, 1], [], []>} : vector<8x8xbf16>, vector<8x32xbf16>, vector<8x32xf32> -> vector<8x32xf32>
    %98 = arith.addf %74, %97 : vector<8x32xf32>
    %cst_33 = arith.constant 0.000000e+00 : f32
    %99 = vector.broadcast %cst_33 : f32 to vector<8x32xf32>
    %100 = arith.select %20, %47, %99 : vector<8x32xi1>, vector<8x32xf32>
    %cst_34 = arith.constant 0.000000e+00 : f32
    %101 = vector.broadcast %cst_34 : f32 to vector<8x32xf32>
    %102 = arith.select %20, %48, %101 : vector<8x32xi1>, vector<8x32xf32>
    %cst_35 = arith.constant 0.000000e+00 : f32
    %103 = vector.broadcast %cst_35 : f32 to vector<8x32xf32>
    %104 = arith.select %20, %49, %103 : vector<8x32xi1>, vector<8x32xf32>
    %105 = arith.truncf %100 : vector<8x32xf32> to vector<8x32xbf16>
    %106 = arith.truncf %102 : vector<8x32xf32> to vector<8x32xbf16>
    %cst_36 = arith.constant dense<0.000000e+00> : vector<8x8xf32>
    %107 = tpu.matmul %105, %106, %cst_36 {dimension_numbers = #tpu.dot_dimension_numbers<[1], [1], [0], [0], [0, 0, 1, 0], [], []>} : vector<8x32xbf16>, vector<8x32xbf16>, vector<8x8xf32> -> vector<8x8xf32>
    %108 = arith.addf %107, %31 : vector<8x8xf32>
    %cst_37 = arith.constant dense<0xFF800000> : vector<8xf32>
    %109 = vector.multi_reduction <maximumf>, %108, %cst_37 [1] : vector<8x8xf32> to vector<8xf32>
    %110 = vector.shape_cast %109 : vector<8xf32> to vector<8x1xf32>
    %111 = vector.broadcast %110 : vector<8x1xf32> to vector<8x8xf32>
    %112 = arith.subf %108, %111 : vector<8x8xf32>
    %113 = math.exp %112 : vector<8x8xf32>
    %cst_38 = arith.constant dense<0.000000e+00> : vector<8xf32>
    %114 = vector.multi_reduction <add>, %113, %cst_38 [1] : vector<8x8xf32> to vector<8xf32>
    %115 = vector.shape_cast %114 : vector<8xf32> to vector<8x1xf32>
    %116 = tpu.reciprocal %115 {approx = true} : vector<8x1xf32> -> vector<8x1xf32>
    %117 = vector.broadcast %116 : vector<8x1xf32> to vector<8x8xf32>
    %118 = arith.mulf %113, %117 : vector<8x8xf32>
    %119 = arith.truncf %118 : vector<8x8xf32> to vector<8x8xbf16>
    %120 = arith.truncf %104 : vector<8x32xf32> to vector<8x32xbf16>
    %cst_39 = arith.constant dense<0.000000e+00> : vector<8x32xf32>
    %121 = tpu.matmul %119, %120, %cst_39 {dimension_numbers = #tpu.dot_dimension_numbers<[1], [0], [0], [1], [0, 0, 1, 1], [], []>} : vector<8x8xbf16>, vector<8x32xbf16>, vector<8x32xf32> -> vector<8x32xf32>
    %122 = arith.addf %98, %121 : vector<8x32xf32>
    %cst_40 = arith.constant 0.000000e+00 : f32
    %123 = vector.broadcast %cst_40 : f32 to vector<8x32xf32>
    %124 = arith.select %25, %47, %123 : vector<8x32xi1>, vector<8x32xf32>
    %cst_41 = arith.constant 0.000000e+00 : f32
    %125 = vector.broadcast %cst_41 : f32 to vector<8x32xf32>
    %126 = arith.select %25, %48, %125 : vector<8x32xi1>, vector<8x32xf32>
    %cst_42 = arith.constant 0.000000e+00 : f32
    %127 = vector.broadcast %cst_42 : f32 to vector<8x32xf32>
    %128 = arith.select %25, %49, %127 : vector<8x32xi1>, vector<8x32xf32>
    %129 = arith.truncf %124 : vector<8x32xf32> to vector<8x32xbf16>
    %130 = arith.truncf %126 : vector<8x32xf32> to vector<8x32xbf16>
    %cst_43 = arith.constant dense<0.000000e+00> : vector<8x8xf32>
    %131 = tpu.matmul %129, %130, %cst_43 {dimension_numbers = #tpu.dot_dimension_numbers<[1], [1], [0], [0], [0, 0, 1, 0], [], []>} : vector<8x32xbf16>, vector<8x32xbf16>, vector<8x8xf32> -> vector<8x8xf32>
    %132 = arith.addf %131, %31 : vector<8x8xf32>
    %cst_44 = arith.constant dense<0xFF800000> : vector<8xf32>
    %133 = vector.multi_reduction <maximumf>, %132, %cst_44 [1] : vector<8x8xf32> to vector<8xf32>
    %134 = vector.shape_cast %133 : vector<8xf32> to vector<8x1xf32>
    %135 = vector.broadcast %134 : vector<8x1xf32> to vector<8x8xf32>
    %136 = arith.subf %132, %135 : vector<8x8xf32>
    %137 = math.exp %136 : vector<8x8xf32>
    %cst_45 = arith.constant dense<0.000000e+00> : vector<8xf32>
    %138 = vector.multi_reduction <add>, %137, %cst_45 [1] : vector<8x8xf32> to vector<8xf32>
    %139 = vector.shape_cast %138 : vector<8xf32> to vector<8x1xf32>
    %140 = tpu.reciprocal %139 {approx = true} : vector<8x1xf32> -> vector<8x1xf32>
    %141 = vector.broadcast %140 : vector<8x1xf32> to vector<8x8xf32>
    %142 = arith.mulf %137, %141 : vector<8x8xf32>
    %143 = arith.truncf %142 : vector<8x8xf32> to vector<8x8xbf16>
    %144 = arith.truncf %128 : vector<8x32xf32> to vector<8x32xbf16>
    %cst_46 = arith.constant dense<0.000000e+00> : vector<8x32xf32>
    %145 = tpu.matmul %143, %144, %cst_46 {dimension_numbers = #tpu.dot_dimension_numbers<[1], [0], [0], [1], [0, 0, 1, 1], [], []>} : vector<8x8xbf16>, vector<8x32xbf16>, vector<8x32xf32> -> vector<8x32xf32>
    %146 = arith.addf %122, %145 : vector<8x32xf32>
    %c0_47 = arith.constant 0 : index
    %c0_48 = arith.constant 0 : index
    %c0_49 = arith.constant 0 : index
    %147 = vector.load %arg5[%c0_47, %c0_48, %c0_49] : memref<2x128x128xbf16, #tpu.memory_space<vmem>>, vector<1x128x128xbf16>
    %148 = vector.shape_cast %147 : vector<1x128x128xbf16> to vector<128x128xbf16>
    %149 = vector.extract_strided_slice %148 {offsets = [0, 0], sizes = [32, 128], strides = [1, 1]} : vector<128x128xbf16> to vector<32x128xbf16>
    %150 = arith.truncf %146 : vector<8x32xf32> to vector<8x32xbf16>
    %cst_50 = arith.constant dense<0.000000e+00> : vector<8x128xf32>
    %151 = tpu.matmul %150, %149, %cst_50 {dimension_numbers = #tpu.dot_dimension_numbers<[1], [0], [0], [1], [0, 0, 1, 1], [], []>} : vector<8x32xbf16>, vector<32x128xbf16>, vector<8x128xf32> -> vector<8x128xf32>
    %c0_51 = arith.constant 0 : index
    %c0_52 = arith.constant 0 : index
    %c0_53 = arith.constant 0 : index
    %152 = vector.load %arg6[%c0_51, %c0_52, %c0_53] : memref<2x1x128xf32, #tpu.memory_space<vmem>>, vector<1x1x128xf32>
    %153 = vector.shape_cast %152 : vector<1x1x128xf32> to vector<1x128xf32>
    %154 = vector.broadcast %153 : vector<1x128xf32> to vector<8x128xf32>
    %155 = arith.addf %151, %154 : vector<8x128xf32>
    %156 = arith.addf %38, %155 : vector<8x128xf32>
    %c0_54 = arith.constant 0 : index
    %c0_55 = arith.constant 0 : index
    %c0_56 = arith.constant 0 : index
    %157 = vector.load %arg7[%c0_54, %c0_55, %c0_56] : memref<2x1x128xf32, #tpu.memory_space<vmem>>, vector<1x1x128xf32>
    %158 = vector.shape_cast %157 : vector<1x1x128xf32> to vector<1x128xf32>
    %c0_57 = arith.constant 0 : index
    %c0_58 = arith.constant 0 : index
    %c0_59 = arith.constant 0 : index
    %159 = vector.load %arg8[%c0_57, %c0_58, %c0_59] : memref<2x1x128xf32, #tpu.memory_space<vmem>>, vector<1x1x128xf32>
    %160 = vector.shape_cast %159 : vector<1x1x128xf32> to vector<1x128xf32>
    %cst_60 = arith.constant dense<0.000000e+00> : vector<8xf32>
    %161 = vector.multi_reduction <add>, %156, %cst_60 [1] : vector<8x128xf32> to vector<8xf32>
    %162 = vector.shape_cast %161 : vector<8xf32> to vector<8x1xf32>
    %cst_61 = arith.constant 3.125000e-02 : f32
    %163 = vector.broadcast %cst_61 : f32 to vector<8x1xf32>
    %164 = arith.mulf %162, %163 : vector<8x1xf32>
    %165 = vector.broadcast %164 : vector<8x1xf32> to vector<8x128xf32>
    %166 = arith.subf %156, %165 : vector<8x128xf32>
    %167 = arith.mulf %166, %4 : vector<8x128xf32>
    %168 = arith.mulf %167, %167 : vector<8x128xf32>
    %cst_62 = arith.constant dense<0.000000e+00> : vector<8xf32>
    %169 = vector.multi_reduction <add>, %168, %cst_62 [1] : vector<8x128xf32> to vector<8xf32>
    %170 = vector.shape_cast %169 : vector<8xf32> to vector<8x1xf32>
    %cst_63 = arith.constant 3.125000e-02 : f32
    %171 = vector.broadcast %cst_63 : f32 to vector<8x1xf32>
    %172 = arith.mulf %170, %171 : vector<8x1xf32>
    %cst_64 = arith.constant 9.99999974E-6 : f32
    %173 = vector.broadcast %cst_64 : f32 to vector<8x1xf32>
    %174 = arith.addf %172, %173 : vector<8x1xf32>
    %175 = math.rsqrt %174 : vector<8x1xf32>
    %176 = vector.broadcast %175 : vector<8x1xf32> to vector<8x128xf32>
    %177 = arith.mulf %167, %176 : vector<8x128xf32>
    %178 = vector.broadcast %158 : vector<1x128xf32> to vector<8x128xf32>
    %179 = arith.mulf %177, %178 : vector<8x128xf32>
    %180 = vector.broadcast %160 : vector<1x128xf32> to vector<8x128xf32>
    %181 = arith.addf %179, %180 : vector<8x128xf32>
    %c0_65 = arith.constant 0 : index
    %c0_66 = arith.constant 0 : index
    %c0_67 = arith.constant 0 : index
    %182 = vector.load %arg9[%c0_65, %c0_66, %c0_67] : memref<2x128x128xbf16, #tpu.memory_space<vmem>>, vector<1x128x128xbf16>
    %183 = vector.shape_cast %182 : vector<1x128x128xbf16> to vector<128x128xbf16>
    %184 = arith.truncf %181 : vector<8x128xf32> to vector<8x128xbf16>
    %cst_68 = arith.constant dense<0.000000e+00> : vector<8x128xf32>
    %185 = tpu.matmul %184, %183, %cst_68 {dimension_numbers = #tpu.dot_dimension_numbers<[1], [0], [0], [1], [0, 0, 1, 1], [], []>} : vector<8x128xbf16>, vector<128x128xbf16>, vector<8x128xf32> -> vector<8x128xf32>
    %c0_69 = arith.constant 0 : index
    %c0_70 = arith.constant 0 : index
    %c0_71 = arith.constant 0 : index
    %186 = vector.load %arg10[%c0_69, %c0_70, %c0_71] : memref<2x1x128xf32, #tpu.memory_space<vmem>>, vector<1x1x128xf32>
    %187 = vector.shape_cast %186 : vector<1x1x128xf32> to vector<1x128xf32>
    %188 = vector.broadcast %187 : vector<1x128xf32> to vector<8x128xf32>
    %189 = arith.addf %185, %188 : vector<8x128xf32>
    %cst_72 = arith.constant 0.000000e+00 : f32
    %190 = vector.broadcast %cst_72 : f32 to vector<8x128xf32>
    %191 = arith.maximumf %189, %190 : vector<8x128xf32>
    %c0_73 = arith.constant 0 : index
    %c0_74 = arith.constant 0 : index
    %c0_75 = arith.constant 0 : index
    %192 = vector.load %arg11[%c0_73, %c0_74, %c0_75] : memref<2x128x128xbf16, #tpu.memory_space<vmem>>, vector<1x128x128xbf16>
    %193 = vector.shape_cast %192 : vector<1x128x128xbf16> to vector<128x128xbf16>
    %194 = arith.truncf %191 : vector<8x128xf32> to vector<8x128xbf16>
    %cst_76 = arith.constant dense<0.000000e+00> : vector<8x128xf32>
    %195 = tpu.matmul %194, %193, %cst_76 {dimension_numbers = #tpu.dot_dimension_numbers<[1], [0], [0], [1], [0, 0, 1, 1], [], []>} : vector<8x128xbf16>, vector<128x128xbf16>, vector<8x128xf32> -> vector<8x128xf32>
    %c0_77 = arith.constant 0 : index
    %c0_78 = arith.constant 0 : index
    %c0_79 = arith.constant 0 : index
    %196 = vector.load %arg12[%c0_77, %c0_78, %c0_79] : memref<2x1x128xf32, #tpu.memory_space<vmem>>, vector<1x1x128xf32>
    %197 = vector.shape_cast %196 : vector<1x1x128xf32> to vector<1x128xf32>
    %198 = vector.broadcast %197 : vector<1x128xf32> to vector<8x128xf32>
    %199 = arith.addf %195, %198 : vector<8x128xf32>
    %200 = arith.addf %181, %199 : vector<8x128xf32>
    %c0_80 = arith.constant 0 : index
    %c0_81 = arith.constant 0 : index
    %c0_82 = arith.constant 0 : index
    %201 = vector.load %arg13[%c0_80, %c0_81, %c0_82] : memref<2x1x128xf32, #tpu.memory_space<vmem>>, vector<1x1x128xf32>
    %202 = vector.shape_cast %201 : vector<1x1x128xf32> to vector<1x128xf32>
    %c0_83 = arith.constant 0 : index
    %c0_84 = arith.constant 0 : index
    %c0_85 = arith.constant 0 : index
    %203 = vector.load %arg14[%c0_83, %c0_84, %c0_85] : memref<2x1x128xf32, #tpu.memory_space<vmem>>, vector<1x1x128xf32>
    %204 = vector.shape_cast %203 : vector<1x1x128xf32> to vector<1x128xf32>
    %cst_86 = arith.constant dense<0.000000e+00> : vector<8xf32>
    %205 = vector.multi_reduction <add>, %200, %cst_86 [1] : vector<8x128xf32> to vector<8xf32>
    %206 = vector.shape_cast %205 : vector<8xf32> to vector<8x1xf32>
    %cst_87 = arith.constant 3.125000e-02 : f32
    %207 = vector.broadcast %cst_87 : f32 to vector<8x1xf32>
    %208 = arith.mulf %206, %207 : vector<8x1xf32>
    %209 = vector.broadcast %208 : vector<8x1xf32> to vector<8x128xf32>
    %210 = arith.subf %200, %209 : vector<8x128xf32>
    %211 = arith.mulf %210, %4 : vector<8x128xf32>
    %212 = arith.mulf %211, %211 : vector<8x128xf32>
    %cst_88 = arith.constant dense<0.000000e+00> : vector<8xf32>
    %213 = vector.multi_reduction <add>, %212, %cst_88 [1] : vector<8x128xf32> to vector<8xf32>
    %214 = vector.shape_cast %213 : vector<8xf32> to vector<8x1xf32>
    %cst_89 = arith.constant 3.125000e-02 : f32
    %215 = vector.broadcast %cst_89 : f32 to vector<8x1xf32>
    %216 = arith.mulf %214, %215 : vector<8x1xf32>
    %cst_90 = arith.constant 9.99999974E-6 : f32
    %217 = vector.broadcast %cst_90 : f32 to vector<8x1xf32>
    %218 = arith.addf %216, %217 : vector<8x1xf32>
    %219 = math.rsqrt %218 : vector<8x1xf32>
    %220 = vector.broadcast %219 : vector<8x1xf32> to vector<8x128xf32>
    %221 = arith.mulf %211, %220 : vector<8x128xf32>
    %222 = vector.broadcast %202 : vector<1x128xf32> to vector<8x128xf32>
    %223 = arith.mulf %221, %222 : vector<8x128xf32>
    %224 = vector.broadcast %204 : vector<1x128xf32> to vector<8x128xf32>
    %225 = arith.addf %223, %224 : vector<8x128xf32>
    %c1 = arith.constant 1 : index
    %c0_91 = arith.constant 0 : index
    %c0_92 = arith.constant 0 : index
    %226 = vector.load %arg3[%c1, %c0_91, %c0_92] : memref<2x128x128xbf16, #tpu.memory_space<vmem>>, vector<1x128x128xbf16>
    %227 = vector.shape_cast %226 : vector<1x128x128xbf16> to vector<128x128xbf16>
    %228 = arith.truncf %225 : vector<8x128xf32> to vector<8x128xbf16>
    %cst_93 = arith.constant dense<0.000000e+00> : vector<8x128xf32>
    %229 = tpu.matmul %228, %227, %cst_93 {dimension_numbers = #tpu.dot_dimension_numbers<[1], [0], [0], [1], [0, 0, 1, 1], [], []>} : vector<8x128xbf16>, vector<128x128xbf16>, vector<8x128xf32> -> vector<8x128xf32>
    %c1_94 = arith.constant 1 : index
    %c0_95 = arith.constant 0 : index
    %c0_96 = arith.constant 0 : index
    %230 = vector.load %arg4[%c1_94, %c0_95, %c0_96] : memref<2x1x128xf32, #tpu.memory_space<vmem>>, vector<1x1x128xf32>
    %231 = vector.shape_cast %230 : vector<1x1x128xf32> to vector<1x128xf32>
    %232 = vector.broadcast %231 : vector<1x128xf32> to vector<8x128xf32>
    %233 = arith.addf %229, %232 : vector<8x128xf32>
    %234 = vector.extract_strided_slice %233 {offsets = [0, 0], sizes = [8, 32], strides = [1, 1]} : vector<8x128xf32> to vector<8x32xf32>
    %235 = vector.extract_strided_slice %233 {offsets = [0, 32], sizes = [8, 32], strides = [1, 1]} : vector<8x128xf32> to vector<8x32xf32>
    %236 = vector.extract_strided_slice %233 {offsets = [0, 64], sizes = [8, 32], strides = [1, 1]} : vector<8x128xf32> to vector<8x32xf32>
    %cst_97 = arith.constant 0.000000e+00 : f32
    %237 = vector.broadcast %cst_97 : f32 to vector<8x32xf32>
    %cst_98 = arith.constant 0.000000e+00 : f32
    %238 = vector.broadcast %cst_98 : f32 to vector<8x32xf32>
    %239 = arith.select %10, %234, %238 : vector<8x32xi1>, vector<8x32xf32>
    %cst_99 = arith.constant 0.000000e+00 : f32
    %240 = vector.broadcast %cst_99 : f32 to vector<8x32xf32>
    %241 = arith.select %10, %235, %240 : vector<8x32xi1>, vector<8x32xf32>
    %cst_100 = arith.constant 0.000000e+00 : f32
    %242 = vector.broadcast %cst_100 : f32 to vector<8x32xf32>
    %243 = arith.select %10, %236, %242 : vector<8x32xi1>, vector<8x32xf32>
    %244 = arith.truncf %239 : vector<8x32xf32> to vector<8x32xbf16>
    %245 = arith.truncf %241 : vector<8x32xf32> to vector<8x32xbf16>
    %cst_101 = arith.constant dense<0.000000e+00> : vector<8x8xf32>
    %246 = tpu.matmul %244, %245, %cst_101 {dimension_numbers = #tpu.dot_dimension_numbers<[1], [1], [0], [0], [0, 0, 1, 0], [], []>} : vector<8x32xbf16>, vector<8x32xbf16>, vector<8x8xf32> -> vector<8x8xf32>
    %247 = arith.addf %246, %31 : vector<8x8xf32>
    %cst_102 = arith.constant dense<0xFF800000> : vector<8xf32>
    %248 = vector.multi_reduction <maximumf>, %247, %cst_102 [1] : vector<8x8xf32> to vector<8xf32>
    %249 = vector.shape_cast %248 : vector<8xf32> to vector<8x1xf32>
    %250 = vector.broadcast %249 : vector<8x1xf32> to vector<8x8xf32>
    %251 = arith.subf %247, %250 : vector<8x8xf32>
    %252 = math.exp %251 : vector<8x8xf32>
    %cst_103 = arith.constant dense<0.000000e+00> : vector<8xf32>
    %253 = vector.multi_reduction <add>, %252, %cst_103 [1] : vector<8x8xf32> to vector<8xf32>
    %254 = vector.shape_cast %253 : vector<8xf32> to vector<8x1xf32>
    %255 = tpu.reciprocal %254 {approx = true} : vector<8x1xf32> -> vector<8x1xf32>
    %256 = vector.broadcast %255 : vector<8x1xf32> to vector<8x8xf32>
    %257 = arith.mulf %252, %256 : vector<8x8xf32>
    %258 = arith.truncf %257 : vector<8x8xf32> to vector<8x8xbf16>
    %259 = arith.truncf %243 : vector<8x32xf32> to vector<8x32xbf16>
    %cst_104 = arith.constant dense<0.000000e+00> : vector<8x32xf32>
    %260 = tpu.matmul %258, %259, %cst_104 {dimension_numbers = #tpu.dot_dimension_numbers<[1], [0], [0], [1], [0, 0, 1, 1], [], []>} : vector<8x8xbf16>, vector<8x32xbf16>, vector<8x32xf32> -> vector<8x32xf32>
    %261 = arith.addf %237, %260 : vector<8x32xf32>
    %cst_105 = arith.constant 0.000000e+00 : f32
    %262 = vector.broadcast %cst_105 : f32 to vector<8x32xf32>
    %263 = arith.select %15, %234, %262 : vector<8x32xi1>, vector<8x32xf32>
    %cst_106 = arith.constant 0.000000e+00 : f32
    %264 = vector.broadcast %cst_106 : f32 to vector<8x32xf32>
    %265 = arith.select %15, %235, %264 : vector<8x32xi1>, vector<8x32xf32>
    %cst_107 = arith.constant 0.000000e+00 : f32
    %266 = vector.broadcast %cst_107 : f32 to vector<8x32xf32>
    %267 = arith.select %15, %236, %266 : vector<8x32xi1>, vector<8x32xf32>
    %268 = arith.truncf %263 : vector<8x32xf32> to vector<8x32xbf16>
    %269 = arith.truncf %265 : vector<8x32xf32> to vector<8x32xbf16>
    %cst_108 = arith.constant dense<0.000000e+00> : vector<8x8xf32>
    %270 = tpu.matmul %268, %269, %cst_108 {dimension_numbers = #tpu.dot_dimension_numbers<[1], [1], [0], [0], [0, 0, 1, 0], [], []>} : vector<8x32xbf16>, vector<8x32xbf16>, vector<8x8xf32> -> vector<8x8xf32>
    %271 = arith.addf %270, %31 : vector<8x8xf32>
    %cst_109 = arith.constant dense<0xFF800000> : vector<8xf32>
    %272 = vector.multi_reduction <maximumf>, %271, %cst_109 [1] : vector<8x8xf32> to vector<8xf32>
    %273 = vector.shape_cast %272 : vector<8xf32> to vector<8x1xf32>
    %274 = vector.broadcast %273 : vector<8x1xf32> to vector<8x8xf32>
    %275 = arith.subf %271, %274 : vector<8x8xf32>
    %276 = math.exp %275 : vector<8x8xf32>
    %cst_110 = arith.constant dense<0.000000e+00> : vector<8xf32>
    %277 = vector.multi_reduction <add>, %276, %cst_110 [1] : vector<8x8xf32> to vector<8xf32>
    %278 = vector.shape_cast %277 : vector<8xf32> to vector<8x1xf32>
    %279 = tpu.reciprocal %278 {approx = true} : vector<8x1xf32> -> vector<8x1xf32>
    %280 = vector.broadcast %279 : vector<8x1xf32> to vector<8x8xf32>
    %281 = arith.mulf %276, %280 : vector<8x8xf32>
    %282 = arith.truncf %281 : vector<8x8xf32> to vector<8x8xbf16>
    %283 = arith.truncf %267 : vector<8x32xf32> to vector<8x32xbf16>
    %cst_111 = arith.constant dense<0.000000e+00> : vector<8x32xf32>
    %284 = tpu.matmul %282, %283, %cst_111 {dimension_numbers = #tpu.dot_dimension_numbers<[1], [0], [0], [1], [0, 0, 1, 1], [], []>} : vector<8x8xbf16>, vector<8x32xbf16>, vector<8x32xf32> -> vector<8x32xf32>
    %285 = arith.addf %261, %284 : vector<8x32xf32>
    %cst_112 = arith.constant 0.000000e+00 : f32
    %286 = vector.broadcast %cst_112 : f32 to vector<8x32xf32>
    %287 = arith.select %20, %234, %286 : vector<8x32xi1>, vector<8x32xf32>
    %cst_113 = arith.constant 0.000000e+00 : f32
    %288 = vector.broadcast %cst_113 : f32 to vector<8x32xf32>
    %289 = arith.select %20, %235, %288 : vector<8x32xi1>, vector<8x32xf32>
    %cst_114 = arith.constant 0.000000e+00 : f32
    %290 = vector.broadcast %cst_114 : f32 to vector<8x32xf32>
    %291 = arith.select %20, %236, %290 : vector<8x32xi1>, vector<8x32xf32>
    %292 = arith.truncf %287 : vector<8x32xf32> to vector<8x32xbf16>
    %293 = arith.truncf %289 : vector<8x32xf32> to vector<8x32xbf16>
    %cst_115 = arith.constant dense<0.000000e+00> : vector<8x8xf32>
    %294 = tpu.matmul %292, %293, %cst_115 {dimension_numbers = #tpu.dot_dimension_numbers<[1], [1], [0], [0], [0, 0, 1, 0], [], []>} : vector<8x32xbf16>, vector<8x32xbf16>, vector<8x8xf32> -> vector<8x8xf32>
    %295 = arith.addf %294, %31 : vector<8x8xf32>
    %cst_116 = arith.constant dense<0xFF800000> : vector<8xf32>
    %296 = vector.multi_reduction <maximumf>, %295, %cst_116 [1] : vector<8x8xf32> to vector<8xf32>
    %297 = vector.shape_cast %296 : vector<8xf32> to vector<8x1xf32>
    %298 = vector.broadcast %297 : vector<8x1xf32> to vector<8x8xf32>
    %299 = arith.subf %295, %298 : vector<8x8xf32>
    %300 = math.exp %299 : vector<8x8xf32>
    %cst_117 = arith.constant dense<0.000000e+00> : vector<8xf32>
    %301 = vector.multi_reduction <add>, %300, %cst_117 [1] : vector<8x8xf32> to vector<8xf32>
    %302 = vector.shape_cast %301 : vector<8xf32> to vector<8x1xf32>
    %303 = tpu.reciprocal %302 {approx = true} : vector<8x1xf32> -> vector<8x1xf32>
    %304 = vector.broadcast %303 : vector<8x1xf32> to vector<8x8xf32>
    %305 = arith.mulf %300, %304 : vector<8x8xf32>
    %306 = arith.truncf %305 : vector<8x8xf32> to vector<8x8xbf16>
    %307 = arith.truncf %291 : vector<8x32xf32> to vector<8x32xbf16>
    %cst_118 = arith.constant dense<0.000000e+00> : vector<8x32xf32>
    %308 = tpu.matmul %306, %307, %cst_118 {dimension_numbers = #tpu.dot_dimension_numbers<[1], [0], [0], [1], [0, 0, 1, 1], [], []>} : vector<8x8xbf16>, vector<8x32xbf16>, vector<8x32xf32> -> vector<8x32xf32>
    %309 = arith.addf %285, %308 : vector<8x32xf32>
    %cst_119 = arith.constant 0.000000e+00 : f32
    %310 = vector.broadcast %cst_119 : f32 to vector<8x32xf32>
    %311 = arith.select %25, %234, %310 : vector<8x32xi1>, vector<8x32xf32>
    %cst_120 = arith.constant 0.000000e+00 : f32
    %312 = vector.broadcast %cst_120 : f32 to vector<8x32xf32>
    %313 = arith.select %25, %235, %312 : vector<8x32xi1>, vector<8x32xf32>
    %cst_121 = arith.constant 0.000000e+00 : f32
    %314 = vector.broadcast %cst_121 : f32 to vector<8x32xf32>
    %315 = arith.select %25, %236, %314 : vector<8x32xi1>, vector<8x32xf32>
    %316 = arith.truncf %311 : vector<8x32xf32> to vector<8x32xbf16>
    %317 = arith.truncf %313 : vector<8x32xf32> to vector<8x32xbf16>
    %cst_122 = arith.constant dense<0.000000e+00> : vector<8x8xf32>
    %318 = tpu.matmul %316, %317, %cst_122 {dimension_numbers = #tpu.dot_dimension_numbers<[1], [1], [0], [0], [0, 0, 1, 0], [], []>} : vector<8x32xbf16>, vector<8x32xbf16>, vector<8x8xf32> -> vector<8x8xf32>
    %319 = arith.addf %318, %31 : vector<8x8xf32>
    %cst_123 = arith.constant dense<0xFF800000> : vector<8xf32>
    %320 = vector.multi_reduction <maximumf>, %319, %cst_123 [1] : vector<8x8xf32> to vector<8xf32>
    %321 = vector.shape_cast %320 : vector<8xf32> to vector<8x1xf32>
    %322 = vector.broadcast %321 : vector<8x1xf32> to vector<8x8xf32>
    %323 = arith.subf %319, %322 : vector<8x8xf32>
    %324 = math.exp %323 : vector<8x8xf32>
    %cst_124 = arith.constant dense<0.000000e+00> : vector<8xf32>
    %325 = vector.multi_reduction <add>, %324, %cst_124 [1] : vector<8x8xf32> to vector<8xf32>
    %326 = vector.shape_cast %325 : vector<8xf32> to vector<8x1xf32>
    %327 = tpu.reciprocal %326 {approx = true} : vector<8x1xf32> -> vector<8x1xf32>
    %328 = vector.broadcast %327 : vector<8x1xf32> to vector<8x8xf32>
    %329 = arith.mulf %324, %328 : vector<8x8xf32>
    %330 = arith.truncf %329 : vector<8x8xf32> to vector<8x8xbf16>
    %331 = arith.truncf %315 : vector<8x32xf32> to vector<8x32xbf16>
    %cst_125 = arith.constant dense<0.000000e+00> : vector<8x32xf32>
    %332 = tpu.matmul %330, %331, %cst_125 {dimension_numbers = #tpu.dot_dimension_numbers<[1], [0], [0], [1], [0, 0, 1, 1], [], []>} : vector<8x8xbf16>, vector<8x32xbf16>, vector<8x32xf32> -> vector<8x32xf32>
    %333 = arith.addf %309, %332 : vector<8x32xf32>
    %c1_126 = arith.constant 1 : index
    %c0_127 = arith.constant 0 : index
    %c0_128 = arith.constant 0 : index
    %334 = vector.load %arg5[%c1_126, %c0_127, %c0_128] : memref<2x128x128xbf16, #tpu.memory_space<vmem>>, vector<1x128x128xbf16>
    %335 = vector.shape_cast %334 : vector<1x128x128xbf16> to vector<128x128xbf16>
    %336 = vector.extract_strided_slice %335 {offsets = [0, 0], sizes = [32, 128], strides = [1, 1]} : vector<128x128xbf16> to vector<32x128xbf16>
    %337 = arith.truncf %333 : vector<8x32xf32> to vector<8x32xbf16>
    %cst_129 = arith.constant dense<0.000000e+00> : vector<8x128xf32>
    %338 = tpu.matmul %337, %336, %cst_129 {dimension_numbers = #tpu.dot_dimension_numbers<[1], [0], [0], [1], [0, 0, 1, 1], [], []>} : vector<8x32xbf16>, vector<32x128xbf16>, vector<8x128xf32> -> vector<8x128xf32>
    %c1_130 = arith.constant 1 : index
    %c0_131 = arith.constant 0 : index
    %c0_132 = arith.constant 0 : index
    %339 = vector.load %arg6[%c1_130, %c0_131, %c0_132] : memref<2x1x128xf32, #tpu.memory_space<vmem>>, vector<1x1x128xf32>
    %340 = vector.shape_cast %339 : vector<1x1x128xf32> to vector<1x128xf32>
    %341 = vector.broadcast %340 : vector<1x128xf32> to vector<8x128xf32>
    %342 = arith.addf %338, %341 : vector<8x128xf32>
    %343 = arith.addf %225, %342 : vector<8x128xf32>
    %c1_133 = arith.constant 1 : index
    %c0_134 = arith.constant 0 : index
    %c0_135 = arith.constant 0 : index
    %344 = vector.load %arg7[%c1_133, %c0_134, %c0_135] : memref<2x1x128xf32, #tpu.memory_space<vmem>>, vector<1x1x128xf32>
    %345 = vector.shape_cast %344 : vector<1x1x128xf32> to vector<1x128xf32>
    %c1_136 = arith.constant 1 : index
    %c0_137 = arith.constant 0 : index
    %c0_138 = arith.constant 0 : index
    %346 = vector.load %arg8[%c1_136, %c0_137, %c0_138] : memref<2x1x128xf32, #tpu.memory_space<vmem>>, vector<1x1x128xf32>
    %347 = vector.shape_cast %346 : vector<1x1x128xf32> to vector<1x128xf32>
    %cst_139 = arith.constant dense<0.000000e+00> : vector<8xf32>
    %348 = vector.multi_reduction <add>, %343, %cst_139 [1] : vector<8x128xf32> to vector<8xf32>
    %349 = vector.shape_cast %348 : vector<8xf32> to vector<8x1xf32>
    %cst_140 = arith.constant 3.125000e-02 : f32
    %350 = vector.broadcast %cst_140 : f32 to vector<8x1xf32>
    %351 = arith.mulf %349, %350 : vector<8x1xf32>
    %352 = vector.broadcast %351 : vector<8x1xf32> to vector<8x128xf32>
    %353 = arith.subf %343, %352 : vector<8x128xf32>
    %354 = arith.mulf %353, %4 : vector<8x128xf32>
    %355 = arith.mulf %354, %354 : vector<8x128xf32>
    %cst_141 = arith.constant dense<0.000000e+00> : vector<8xf32>
    %356 = vector.multi_reduction <add>, %355, %cst_141 [1] : vector<8x128xf32> to vector<8xf32>
    %357 = vector.shape_cast %356 : vector<8xf32> to vector<8x1xf32>
    %cst_142 = arith.constant 3.125000e-02 : f32
    %358 = vector.broadcast %cst_142 : f32 to vector<8x1xf32>
    %359 = arith.mulf %357, %358 : vector<8x1xf32>
    %cst_143 = arith.constant 9.99999974E-6 : f32
    %360 = vector.broadcast %cst_143 : f32 to vector<8x1xf32>
    %361 = arith.addf %359, %360 : vector<8x1xf32>
    %362 = math.rsqrt %361 : vector<8x1xf32>
    %363 = vector.broadcast %362 : vector<8x1xf32> to vector<8x128xf32>
    %364 = arith.mulf %354, %363 : vector<8x128xf32>
    %365 = vector.broadcast %345 : vector<1x128xf32> to vector<8x128xf32>
    %366 = arith.mulf %364, %365 : vector<8x128xf32>
    %367 = vector.broadcast %347 : vector<1x128xf32> to vector<8x128xf32>
    %368 = arith.addf %366, %367 : vector<8x128xf32>
    %c1_144 = arith.constant 1 : index
    %c0_145 = arith.constant 0 : index
    %c0_146 = arith.constant 0 : index
    %369 = vector.load %arg9[%c1_144, %c0_145, %c0_146] : memref<2x128x128xbf16, #tpu.memory_space<vmem>>, vector<1x128x128xbf16>
    %370 = vector.shape_cast %369 : vector<1x128x128xbf16> to vector<128x128xbf16>
    %371 = arith.truncf %368 : vector<8x128xf32> to vector<8x128xbf16>
    %cst_147 = arith.constant dense<0.000000e+00> : vector<8x128xf32>
    %372 = tpu.matmul %371, %370, %cst_147 {dimension_numbers = #tpu.dot_dimension_numbers<[1], [0], [0], [1], [0, 0, 1, 1], [], []>} : vector<8x128xbf16>, vector<128x128xbf16>, vector<8x128xf32> -> vector<8x128xf32>
    %c1_148 = arith.constant 1 : index
    %c0_149 = arith.constant 0 : index
    %c0_150 = arith.constant 0 : index
    %373 = vector.load %arg10[%c1_148, %c0_149, %c0_150] : memref<2x1x128xf32, #tpu.memory_space<vmem>>, vector<1x1x128xf32>
    %374 = vector.shape_cast %373 : vector<1x1x128xf32> to vector<1x128xf32>
    %375 = vector.broadcast %374 : vector<1x128xf32> to vector<8x128xf32>
    %376 = arith.addf %372, %375 : vector<8x128xf32>
    %cst_151 = arith.constant 0.000000e+00 : f32
    %377 = vector.broadcast %cst_151 : f32 to vector<8x128xf32>
    %378 = arith.maximumf %376, %377 : vector<8x128xf32>
    %c1_152 = arith.constant 1 : index
    %c0_153 = arith.constant 0 : index
    %c0_154 = arith.constant 0 : index
    %379 = vector.load %arg11[%c1_152, %c0_153, %c0_154] : memref<2x128x128xbf16, #tpu.memory_space<vmem>>, vector<1x128x128xbf16>
    %380 = vector.shape_cast %379 : vector<1x128x128xbf16> to vector<128x128xbf16>
    %381 = arith.truncf %378 : vector<8x128xf32> to vector<8x128xbf16>
    %cst_155 = arith.constant dense<0.000000e+00> : vector<8x128xf32>
    %382 = tpu.matmul %381, %380, %cst_155 {dimension_numbers = #tpu.dot_dimension_numbers<[1], [0], [0], [1], [0, 0, 1, 1], [], []>} : vector<8x128xbf16>, vector<128x128xbf16>, vector<8x128xf32> -> vector<8x128xf32>
    %c1_156 = arith.constant 1 : index
    %c0_157 = arith.constant 0 : index
    %c0_158 = arith.constant 0 : index
    %383 = vector.load %arg12[%c1_156, %c0_157, %c0_158] : memref<2x1x128xf32, #tpu.memory_space<vmem>>, vector<1x1x128xf32>
    %384 = vector.shape_cast %383 : vector<1x1x128xf32> to vector<1x128xf32>
    %385 = vector.broadcast %384 : vector<1x128xf32> to vector<8x128xf32>
    %386 = arith.addf %382, %385 : vector<8x128xf32>
    %387 = arith.addf %368, %386 : vector<8x128xf32>
    %c1_159 = arith.constant 1 : index
    %c0_160 = arith.constant 0 : index
    %c0_161 = arith.constant 0 : index
    %388 = vector.load %arg13[%c1_159, %c0_160, %c0_161] : memref<2x1x128xf32, #tpu.memory_space<vmem>>, vector<1x1x128xf32>
    %389 = vector.shape_cast %388 : vector<1x1x128xf32> to vector<1x128xf32>
    %c1_162 = arith.constant 1 : index
    %c0_163 = arith.constant 0 : index
    %c0_164 = arith.constant 0 : index
    %390 = vector.load %arg14[%c1_162, %c0_163, %c0_164] : memref<2x1x128xf32, #tpu.memory_space<vmem>>, vector<1x1x128xf32>
    %391 = vector.shape_cast %390 : vector<1x1x128xf32> to vector<1x128xf32>
    %cst_165 = arith.constant dense<0.000000e+00> : vector<8xf32>
    %392 = vector.multi_reduction <add>, %387, %cst_165 [1] : vector<8x128xf32> to vector<8xf32>
    %393 = vector.shape_cast %392 : vector<8xf32> to vector<8x1xf32>
    %cst_166 = arith.constant 3.125000e-02 : f32
    %394 = vector.broadcast %cst_166 : f32 to vector<8x1xf32>
    %395 = arith.mulf %393, %394 : vector<8x1xf32>
    %396 = vector.broadcast %395 : vector<8x1xf32> to vector<8x128xf32>
    %397 = arith.subf %387, %396 : vector<8x128xf32>
    %398 = arith.mulf %397, %4 : vector<8x128xf32>
    %399 = arith.mulf %398, %398 : vector<8x128xf32>
    %cst_167 = arith.constant dense<0.000000e+00> : vector<8xf32>
    %400 = vector.multi_reduction <add>, %399, %cst_167 [1] : vector<8x128xf32> to vector<8xf32>
    %401 = vector.shape_cast %400 : vector<8xf32> to vector<8x1xf32>
    %cst_168 = arith.constant 3.125000e-02 : f32
    %402 = vector.broadcast %cst_168 : f32 to vector<8x1xf32>
    %403 = arith.mulf %401, %402 : vector<8x1xf32>
    %cst_169 = arith.constant 9.99999974E-6 : f32
    %404 = vector.broadcast %cst_169 : f32 to vector<8x1xf32>
    %405 = arith.addf %403, %404 : vector<8x1xf32>
    %406 = math.rsqrt %405 : vector<8x1xf32>
    %407 = vector.broadcast %406 : vector<8x1xf32> to vector<8x128xf32>
    %408 = arith.mulf %398, %407 : vector<8x128xf32>
    %409 = vector.broadcast %389 : vector<1x128xf32> to vector<8x128xf32>
    %410 = arith.mulf %408, %409 : vector<8x128xf32>
    %411 = vector.broadcast %391 : vector<1x128xf32> to vector<8x128xf32>
    %412 = arith.addf %410, %411 : vector<8x128xf32>
    %c0_170 = arith.constant 0 : index
    %c0_171 = arith.constant 0 : index
    %413 = vector.load %arg15[%c0_170, %c0_171] : memref<8x128xf32, #tpu.memory_space<vmem>>, vector<8x128xf32>
    tpu.vector_store %arg15[%c0_170, %c0_171], %412 {strides = array<i32>} : memref<8x128xf32, #tpu.memory_space<vmem>>, vector<8x128xf32>,
    return
  }
}

</mosaic_0001>

<bundles_post_ra>
// kernel: _lambda_.1
= control target key start
LH: loop header
LB: loop body
LE: loop exit
PB: predicated region body
PF: predicated region fallthrough
CT: control target
= control target key end

     0   :  { %20 = vsyncpa [#allocation3], 0  ;;  %s3749_s0 = inlined_call_operand.vmem [shape: f32[8,128], index: 0, kind: input, shape index: {}]   ;;  %s3750_s1 = inlined_call_operand.hbm [shape: bf16[128,128], index: 1, kind: input, shape index: {}]   ;;  %s3751_s2 = inlined_call_operand.hbm [shape: f32[1,128], index: 2, kind: input, shape index: {}]   ;;  %s3752_s3 = inlined_call_operand.hbm [shape: bf16[2,128,128], index: 3, kind: input, shape index: {}]   ;;  %s3753_s4 = inlined_call_operand.vmem [shape: f32[2,1,128], index: 4, kind: input, shape index: {}]   ;;  %s3754_s5 = inlined_call_operand.hbm [shape: bf16[2,128,128], index: 5, kind: input, shape index: {}]   ;;  %s3755_s6 = inlined_call_operand.hbm [shape: f32[2,1,128], index: 6, kind: input, shape index: {}]   ;;  %s3756_s7 = inlined_call_operand.hbm [shape: f32[2,1,128], index: 7, kind: input, shape index: {}]   ;;  %s3757_s8 = inlined_call_operand.hbm [shape: f32[2,1,128], index: 8, kind: input, shape index: {}]   ;;  %s3758_s9 = inlined_call_operand.hbm [shape: bf16[2,128,128], index: 9, kind: input, shape index: {}]   ;;  %s3759_s10 = inlined_call_operand.hbm [shape: f32[2,1,128], index: 10, kind: input, shape index: {}]   ;;  %s3760_s11 = inlined_call_operand.vmem [shape: bf16[2,128,128], index: 11, kind: input, shape index: {}]   ;;  %s3761_s12 = inlined_call_operand.hbm [shape: f32[2,1,128], index: 12, kind: input, shape index: {}]   ;;  %s3762_s13 = inlined_call_operand.hbm [shape: f32[2,1,128], index: 13, kind: input, shape index: {}]   ;;  %s3763_s14 = inlined_call_operand.hbm [shape: f32[2,1,128], index: 14, kind: input, shape index: {}]   ;;  %s3764_s15 = inlined_call_operand.vmem [shape: f32[8,128], index: 15, kind: output, shape index: {}]  }
   0x1   :  { %21 = vsyncpa [#allocation5], 0 }
   0x2   :  { %22 = vsyncpa [#allocation8], 0 }
   0x3   :  { %23 = vsyncpa [#allocation11], 0 }
   0x4   :  { %24 = vsyncpa [#allocation14], 0 }
   0x5   :  { %25 = vsyncpa [#allocation17], 0 }
   0x6   :  { %26 = vsyncpa [#allocation20], 0  ;;  %s3080_s18 = smov [#allocation4]   ;;  %s2802_s22 = scalar_lea.hbm %s3751_s2, 16 }
   0x7   :  { %s47_s19 = sshll.u32 %s3080_s18, 4  ;;  %p2803_p0 = scmp.ne.s32.totalorder %s3751_s2, %s2802_s22  ;;  %s48_s19 = int_to_ptr.vmem [resolvable:$true] %s47_s19 }
   0x8   :  { %p2806_p1 = scmp.lt.u32.totalorder %s2802_s22, %s3751_s2 }
   0xa   :  { %p2808_p2 = pnand %p2806_p1, %p2803_p0 }
   0xc   :  { %2811 = shalt.err (!%p2808_p2)
}
   0xd   :  { %s2812_s27 = scalar_lea.vmem %s48_s19, 16  ;;  %s2816_s28 = scalar_lea.vmem %s48_s19, 32 }
   0xe   :  { %p2813_p3 = scmp.ne.s32.totalorder %s48_s19, %s2812_s27  ;;  %p2817_p4 = scmp.lt.s32.totalorder %s48_s19, %s48_s19 }
   0xf   :  { %p2818_p5 = scmp.lt.s32.totalorder %s2816_s28, %s2812_s27 }
  0x11   :  { %p2819_p6 = por %p2818_p5, %p2817_p4 }
  0x13   :  { %p2820_p7 = pnand %p2819_p6, %p2813_p3 }
  0x15   :  { %2823 = shalt.err (!%p2820_p7)
}
  0x16   :  { %50 = dma.hbm_to_vmem [thread:$0]  %s3751_s2, 16, %s48_s19, [#allocation5]  }
  0x17   :  { %s3081_s16 = smov [#allocation7]   ;;  %s2824_s21 = scalar_lea.hbm %s3754_s5, 2048 }
  0x18   :  { %s70_s17 = sshll.u32 %s3081_s16, 4  ;;  %p2825_p8 = scmp.ne.s32.totalorder %s3754_s5, %s2824_s21  ;;  %s71_s17 = int_to_ptr.vmem [resolvable:$true] %s70_s17 }
  0x19   :  { %p2828_p9 = scmp.lt.u32.totalorder %s2824_s21, %s3754_s5 }
  0x1b   :  { %p2830_p10 = pnand %p2828_p9, %p2825_p8 }
  0x1d   :  { %2833 = shalt.err (!%p2830_p10)
}
  0x1e   :  { %s2834_s26 = scalar_lea.vmem %s71_s17, 2048  ;;  %p2839_p12 = scmp.lt.s32.totalorder %s71_s17, %s71_s17 }
  0x1f   :  { %p2835_p11 = scmp.ne.s32.totalorder %s71_s17, %s2834_s26  ;;  %p2840_p13 = scmp.lt.s32.totalorder %s2834_s26, %s2834_s26 }
  0x21   :  { %p2841_p0 = por %p2840_p13, %p2839_p12 }
  0x23   :  { %p2842_p1 = pnand %p2841_p0, %p2835_p11 }
  0x25   :  { %2845 = shalt.err (!%p2842_p1)
}
  0x26   :  { %s3082_s2 = smov 64   ;;  %s3083_s19 = smov 4  }
  0x27   :  { %76 = dma.hbm_to_vmem [thread:$0]  %s3754_s5, 2048, %s71_s17, [#allocation8], %s3082_s2, %s3082_s2, %s3083_s19  }
  0x28   :  { %s3084_s29 = smov [#allocation10]   ;;  %s3085_s16 = smov [#allocation13]  }
  0x29   :  { %s94_s30 = sshll.u32 %s3084_s29, 4  ;;  %s118_s18 = sshll.u32 %s3085_s16, 4  ;;  %s95_s30 = int_to_ptr.vmem [resolvable:$true] %s94_s30  ;;  %s3207_s18 = int_to_ptr.vmem [resolvable:$true] %s118_s18 }
  0x2a   :  { %s2846_s22 = scalar_lea.hbm %s3756_s7, 32 }
  0x2b   :  { %p2847_p2 = scmp.ne.s32.totalorder %s3756_s7, %s2846_s22  ;;  %p2850_p3 = scmp.lt.u32.totalorder %s2846_s22, %s3756_s7 }
  0x2d   :  { %p2852_p4 = pnand %p2850_p3, %p2847_p2 }
  0x2f   :  { %2855 = shalt.err (!%p2852_p4)
}
  0x30   :  { %s2856_s5 = scalar_lea.vmem %s95_s30, 32  ;;  %p2861_p6 = scmp.lt.s32.totalorder %s95_s30, %s95_s30 }
  0x31   :  { %p2857_p5 = scmp.ne.s32.totalorder %s95_s30, %s2856_s5  ;;  %p2862_p7 = scmp.lt.s32.totalorder %s2856_s5, %s2856_s5 }
  0x33   :  { %p2863_p8 = por %p2862_p7, %p2861_p6 }
  0x35   :  { %p2864_p9 = pnand %p2863_p8, %p2857_p5 }
  0x37   :  { %2867 = shalt.err (!%p2864_p9)
}
  0x38   :  { %s3086_s17 = smov 16   ;;  %s3087_s27 = smov 1  }
  0x39   :  { %100 = dma.hbm_to_vmem [thread:$0]  %s3756_s7, 32, %s95_s30, [#allocation11], %s3086_s17, %s3086_s17, %s3087_s27  }
  0x3a   :  { %s2868_s21 = scalar_lea.hbm %s3758_s9, 2048 }
  0x3b   :  { %p2869_p10 = scmp.ne.s32.totalorder %s3758_s9, %s2868_s21  ;;  %p2872_p11 = scmp.lt.u32.totalorder %s2868_s21, %s3758_s9 }
  0x3d   :  { %p2874_p12 = pnand %p2872_p11, %p2869_p10 }
  0x3f   :  { %2877 = shalt.err (!%p2874_p12)
}
  0x40   :  { %s2878_s26 = scalar_lea.vmem %s3207_s18, 2048  ;;  %p2883_p0 = scmp.lt.s32.totalorder %s3207_s18, %s3207_s18 }
  0x41   :  { %p2879_p13 = scmp.ne.s32.totalorder %s3207_s18, %s2878_s26  ;;  %p2884_p1 = scmp.lt.s32.totalorder %s2878_s26, %s2878_s26 }
  0x43   :  { %p2885_p2 = por %p2884_p1, %p2883_p0 }
  0x45   :  { %p2886_p3 = pnand %p2885_p2, %p2879_p13 }
  0x47   :  { %2889 = shalt.err (!%p2886_p3)
}
  0x48   :  { %124 = dma.hbm_to_vmem [thread:$0]  %s3758_s9, 2048, %s3207_s18, [#allocation14], %s3082_s2, %s3082_s2, %s3083_s19  }
  0x49   :  { %s3088_s5 = smov [#allocation16]   ;;  %s3089_s29 = smov [#allocation2]  }
  0x4a   :  { %s144_s28 = sshll.u32 %s3088_s5, 4  ;;  %s34_s16 = sshll.u32 %s3089_s29, 4  ;;  %s145_s28 = int_to_ptr.vmem [resolvable:$true] %s144_s28  ;;  %s3244_s16 = int_to_ptr.vmem [resolvable:$true] %s34_s16 }
  0x4b   :  { %s2890_s22 = scalar_lea.hbm %s3761_s12, 32 }
  0x4c   :  { %p2891_p4 = scmp.ne.s32.totalorder %s3761_s12, %s2890_s22  ;;  %p2894_p5 = scmp.lt.u32.totalorder %s2890_s22, %s3761_s12 }
  0x4e   :  { %p2896_p6 = pnand %p2894_p5, %p2891_p4 }
  0x50   :  { %2899 = shalt.err (!%p2896_p6)
}
  0x51   :  { %s2900_s9 = scalar_lea.vmem %s145_s28, 32  ;;  %p2905_p8 = scmp.lt.s32.totalorder %s145_s28, %s145_s28 }
  0x52   :  { %p2901_p7 = scmp.ne.s32.totalorder %s145_s28, %s2900_s9  ;;  %p2906_p9 = scmp.lt.s32.totalorder %s2900_s9, %s2900_s9 }
  0x54   :  { %p2907_p10 = por %p2906_p9, %p2905_p8 }
  0x56   :  { %p2908_p11 = pnand %p2907_p10, %p2901_p7 }
  0x58   :  { %2911 = shalt.err (!%p2908_p11)
}
  0x59   :  { %150 = dma.hbm_to_vmem [thread:$0]  %s3761_s12, 32, %s145_s28, [#allocation17], %s3086_s17, %s3086_s17, %s3087_s27  }
  0x5a   :  { %s2912_s29 = scalar_lea.hbm %s3750_s1, 1024 }
  0x5b   :  { %p2913_p12 = scmp.ne.s32.totalorder %s3750_s1, %s2912_s29  ;;  %p2916_p13 = scmp.lt.u32.totalorder %s2912_s29, %s3750_s1 }
  0x5d   :  { %p2918_p0 = pnand %p2916_p13, %p2913_p12 }
  0x5f   :  { %2921 = shalt.err (!%p2918_p0)
}
  0x60   :  { %s2922_s24 = scalar_lea.vmem %s3244_s16, 1024  ;;  %p2927_p2 = scmp.lt.s32.totalorder %s3244_s16, %s3244_s16 }
  0x61   :  { %p2923_p1 = scmp.ne.s32.totalorder %s3244_s16, %s2922_s24  ;;  %p2928_p3 = scmp.lt.s32.totalorder %s2922_s24, %s2922_s24 }
  0x63   :  { %p2929_p4 = por %p2928_p3, %p2927_p2 }
  0x65   :  { %p2930_p5 = pnand %p2929_p4, %p2923_p1 }
  0x67   :  { %2933 = shalt.err (!%p2930_p5)
}
  0x68   :  { %40 = dma.hbm_to_vmem [thread:$0]  %s3750_s1, 1024, %s3244_s16, [#allocation3], %s3082_s2, %s3082_s2, %s3083_s19  }
  0x69   :  { %s3090_s25 = smov [#allocation6]   ;;  %s3091_s9 = smov [#allocation9]  }
  0x6a   :  { %s56_s26 = sshll.u32 %s3090_s25, 4  ;;  %s82_s18 = sshll.u32 %s3091_s9, 4  ;;  %s57_s26 = int_to_ptr.vmem [resolvable:$true] %s56_s26  ;;  %s3281_s18 = int_to_ptr.vmem [resolvable:$true] %s82_s18 }
  0x6b   :  { %s2934_s5 = scalar_lea.hbm %s3752_s3, 2048 }
  0x6c   :  { %p2935_p6 = scmp.ne.s32.totalorder %s3752_s3, %s2934_s5  ;;  %p2938_p7 = scmp.lt.u32.totalorder %s2934_s5, %s3752_s3 }
  0x6e   :  { %p2940_p8 = pnand %p2938_p7, %p2935_p6 }
  0x70   :  { %2943 = shalt.err (!%p2940_p8)
}
  0x71   :  { %s2944_s1 = scalar_lea.vmem %s57_s26, 2048  ;;  %p2949_p10 = scmp.lt.s32.totalorder %s57_s26, %s57_s26 }
  0x72   :  { %p2945_p9 = scmp.ne.s32.totalorder %s57_s26, %s2944_s1  ;;  %p2950_p11 = scmp.lt.s32.totalorder %s2944_s1, %s2944_s1 }
  0x74   :  { %p2951_p12 = por %p2950_p11, %p2949_p10 }
  0x76   :  { %p2952_p13 = pnand %p2951_p12, %p2945_p9 }
  0x78   :  { %2955 = shalt.err (!%p2952_p13)
}
  0x79   :  { %62 = dma.hbm_to_vmem [thread:$0]  %s3752_s3, 2048, %s57_s26, [#allocation5], %s3082_s2, %s3082_s2, %s3083_s19  }
  0x7a   :  { %s2956_s28 = scalar_lea.hbm %s3755_s6, 32 }
  0x7b   :  { %p2957_p0 = scmp.ne.s32.totalorder %s3755_s6, %s2956_s28  ;;  %p2960_p1 = scmp.lt.u32.totalorder %s2956_s28, %s3755_s6 }
  0x7d   :  { %p2962_p2 = pnand %p2960_p1, %p2957_p0 }
  0x7f   :  { %2965 = shalt.err (!%p2962_p2)
}
  0x80   :  { %s2966_s5 = scalar_lea.vmem %s3281_s18, 32  ;;  %p2971_p4 = scmp.lt.s32.totalorder %s3281_s18, %s3281_s18 }
  0x81   :  { %p2967_p3 = scmp.ne.s32.totalorder %s3281_s18, %s2966_s5  ;;  %p2972_p5 = scmp.lt.s32.totalorder %s2966_s5, %s2966_s5 }
  0x83   :  { %p2973_p6 = por %p2972_p5, %p2971_p4 }
  0x85   :  { %p2974_p7 = pnand %p2973_p6, %p2967_p3 }
  0x87   :  { %2977 = shalt.err (!%p2974_p7)
}
  0x88   :  { %88 = dma.hbm_to_vmem [thread:$0]  %s3755_s6, 32, %s3281_s18, [#allocation8], %s3086_s17, %s3086_s17, %s3087_s27  }
  0x89   :  { %s3092_s26 = smov [#allocation12]   ;;  %s3093_s20 = smov [#allocation15]  }
  0x8a   :  { %s106_s29 = sshll.u32 %s3092_s26, 4  ;;  %s130_s21 = sshll.u32 %s3093_s20, 4  ;;  %s107_s29 = int_to_ptr.vmem [resolvable:$true] %s106_s29  ;;  %s3318_s21 = int_to_ptr.vmem [resolvable:$true] %s130_s21 }
  0x8b   :  { %s2978_s16 = scalar_lea.hbm %s3757_s8, 32 }
  0x8c   :  { %p2979_p8 = scmp.ne.s32.totalorder %s3757_s8, %s2978_s16  ;;  %p2982_p9 = scmp.lt.u32.totalorder %s2978_s16, %s3757_s8 }
  0x8e   :  { %p2984_p10 = pnand %p2982_p9, %p2979_p8 }
  0x90   :  { %2987 = shalt.err (!%p2984_p10)
}
  0x91   :  { %s2988_s6 = scalar_lea.vmem %s107_s29, 32  ;;  %p2993_p12 = scmp.lt.s32.totalorder %s107_s29, %s107_s29 }
  0x92   :  { %p2989_p11 = scmp.ne.s32.totalorder %s107_s29, %s2988_s6  ;;  %p2994_p13 = scmp.lt.s32.totalorder %s2988_s6, %s2988_s6 }
  0x94   :  { %p2995_p0 = por %p2994_p13, %p2993_p12 }
  0x96   :  { %p2996_p1 = pnand %p2995_p0, %p2989_p11 }
  0x98   :  { %2999 = shalt.err (!%p2996_p1)
}
  0x99   :  { %112 = dma.hbm_to_vmem [thread:$0]  %s3757_s8, 32, %s107_s29, [#allocation11], %s3086_s17, %s3086_s17, %s3087_s27  }
  0x9a   :  { %s3000_s30 = scalar_lea.hbm %s3759_s10, 32 }
  0x9b   :  { %p3001_p2 = scmp.ne.s32.totalorder %s3759_s10, %s3000_s30  ;;  %p3004_p3 = scmp.lt.u32.totalorder %s3000_s30, %s3759_s10 }
  0x9d   :  { %p3006_p4 = pnand %p3004_p3, %p3001_p2 }
  0x9f   :  { %3009 = shalt.err (!%p3006_p4)
}
  0xa0   :  { %s3010_s20 = scalar_lea.vmem %s3318_s21, 32  ;;  %p3015_p6 = scmp.lt.s32.totalorder %s3318_s21, %s3318_s21 }
  0xa1   :  { %p3011_p5 = scmp.ne.s32.totalorder %s3318_s21, %s3010_s20  ;;  %p3016_p7 = scmp.lt.s32.totalorder %s3010_s20, %s3010_s20 }
  0xa3   :  { %p3017_p8 = por %p3016_p7, %p3015_p6 }
  0xa5   :  { %p3018_p9 = pnand %p3017_p8, %p3011_p5 }
  0xa7   :  { %3021 = shalt.err (!%p3018_p9)
}
  0xa8   :  { %136 = dma.hbm_to_vmem [thread:$0]  %s3759_s10, 32, %s3318_s21, [#allocation14], %s3086_s17, %s3086_s17, %s3087_s27  }
  0xa9   :  { %s3094_s22 = smov [#allocation18]   ;;  %s3095_s16 = smov [#allocation19]  }
  0xaa   :  { %s156_s1 = sshll.u32 %s3094_s22, 4  ;;  %s168_s23 = sshll.u32 %s3095_s16, 4  ;;  %s157_s1 = int_to_ptr.vmem [resolvable:$true] %s156_s1  ;;  %s3355_s23 = int_to_ptr.vmem [resolvable:$true] %s168_s23 }
  0xab   :  { %s3022_s28 = scalar_lea.hbm %s3762_s13, 32 }
  0xac   :  { %p3023_p10 = scmp.ne.s32.totalorder %s3762_s13, %s3022_s28  ;;  %p3026_p11 = scmp.lt.u32.totalorder %s3022_s28, %s3762_s13 }
  0xae   :  { %p3028_p12 = pnand %p3026_p11, %p3023_p10 }
  0xb0   :  { %3031 = shalt.err (!%p3028_p12)
}
  0xb1   :  { %s3032_s10 = scalar_lea.vmem %s157_s1, 32  ;;  %p3037_p0 = scmp.lt.s32.totalorder %s157_s1, %s157_s1 }
  0xb2   :  { %p3033_p13 = scmp.ne.s32.totalorder %s157_s1, %s3032_s10  ;;  %p3038_p1 = scmp.lt.s32.totalorder %s3032_s10, %s3032_s10 }
  0xb4   :  { %p3039_p2 = por %p3038_p1, %p3037_p0 }
  0xb6   :  { %p3040_p3 = pnand %p3039_p2, %p3033_p13 }
  0xb8   :  { %3043 = shalt.err (!%p3040_p3)
}
  0xb9   :  { %162 = dma.hbm_to_vmem [thread:$0]  %s3762_s13, 32, %s157_s1, [#allocation17], %s3086_s17, %s3086_s17, %s3087_s27  }
  0xba   :  { %s3044_s3 = scalar_lea.hbm %s3763_s14, 32 }
  0xbb   :  { %p3045_p4 = scmp.ne.s32.totalorder %s3763_s14, %s3044_s3  ;;  %p3048_p5 = scmp.lt.u32.totalorder %s3044_s3, %s3763_s14 }
  0xbd   :  { %p3050_p6 = pnand %p3048_p5, %p3045_p4 }
  0xbf   :  { %3053 = shalt.err (!%p3050_p6)
}
  0xc0   :  { %s3054_s29 = scalar_lea.vmem %s3355_s23, 32  ;;  %p3059_p8 = scmp.lt.s32.totalorder %s3355_s23, %s3355_s23 }
  0xc1   :  { %p3055_p7 = scmp.ne.s32.totalorder %s3355_s23, %s3054_s29  ;;  %p3060_p9 = scmp.lt.s32.totalorder %s3054_s29, %s3054_s29 }
  0xc3   :  { %p3061_p10 = por %p3060_p9, %p3059_p8 }
  0xc5   :  { %p3062_p11 = pnand %p3061_p10, %p3055_p7 }
  0xc7   :  { %3065 = shalt.err (!%p3062_p11)
}
  0xc8   :  { %174 = dma.hbm_to_vmem [thread:$0]  %s3763_s14, 32, %s3355_s23, [#allocation20], %s3086_s17, %s3086_s17, %s3087_s27  }
  0xc9   :  { %3066 = dma.done.wait [#allocation3], 1024  }
  0xca   :  { %3067 = vsyncadd [#allocation3], 4294966272 }
  0xcb   :  { %3068 = dma.done.wait [#allocation5], 2064  }
  0xcc   :  { %3069 = vsyncadd [#allocation5], 4294965232 }
  0xcd   :  { %3070 = dma.done.wait [#allocation8], 2080  }
  0xce   :  { %3071 = vsyncadd [#allocation8], 4294965216 }
  0xcf   :  { %3072 = dma.done.wait [#allocation11], 64  }
  0xd0   :  { %3073 = vsyncadd [#allocation11], 4294967232 }
  0xd1   :  { %3074 = dma.done.wait [#allocation14], 2080  }
  0xd2   :  { %3075 = vsyncadd [#allocation14], 4294965216 }
  0xd3   :  { %3076 = dma.done.wait [#allocation17], 64  }
  0xd4   :  { %3077 = vsyncadd [#allocation17], 4294967232 }
  0xd5   :  { %3078 = dma.done.wait [#allocation20], 32  }
  0xd6   :  { %3079 = vsyncadd [#allocation20], 4294967264  ;;  %v3096_v0 = vmov 0.0   ;;  %vm3097_vm0 = vmmov 0   ;;  %v2702_v1 = vld [vmem:[#allocation2] sm:$0xff]   ;;  %v2703_v2 = vld [vmem:[#allocation2 + $0x8] sm:$0xff]   ;;  %v212_v32 = vlaneseq }
  0xd7   :  { %2406 = vmatprep.subr.bf16.mxu0 %v3096_v0  ;;  %2422 = vmatprep.mubr.msk.bf16.mxu0 %vm3097_vm0, %v3096_v0  ;;  %v2704_v3 = vld [vmem:[#allocation2 + $0x10] sm:$0xff]   ;;  %v2710_v4 = vld [vmem:[#allocation6] sm:$0xff]   ;;  %v2705_v5 = vld [vmem:[#allocation2 + $0x18] sm:$0xff]   ;;  %s3098_s1 = smov 96   ;;  %vm467_vm6 = vcmask 261120   ;;  %vm514_vm13 = vcmask 64512  }
  0xd8   :  { %2426 = vmatprep.subr.bf16.mxu1 %v3096_v0  ;;  %2442 = vmatprep.mubr.msk.bf16.mxu1 %vm3097_vm0, %v3096_v0  ;;  %v2711_v6 = vld [vmem:[#allocation6 + $0x8] sm:$0xff]   ;;  %v2706_v7 = vld [vmem:[#allocation2 + $0x20] sm:$0xff]   ;;  %v2712_v8 = vld [vmem:[#allocation6 + $0x10] sm:$0xff]   ;;  %v3432_v33 = vand.u32 127, %v212_v32  ;;  %v3099_v58 = vmov -1e+30  }
  0xd9   :  { %2407 = vmatpush3.bf16.msra.mxu0 %v2702_v1  ;;  %2427 = vmatpush3.bf16.msra.mxu1 %v2710_v4  ;;  %v2707_v9 = vld [vmem:[#allocation2 + $0x28] sm:$0xff]   ;;  %v2713_v10 = vld [vmem:[#allocation6 + $0x18] sm:$0xff]   ;;  %v2708_v11 = vld [vmem:[#allocation2 + $0x30] sm:$0xff]   ;;  %vm595_vm14 = vcmask 1043456  }
  0xda   :  { %2408 = vmatprep.subr.bf16.mxu0 %v3096_v0  ;;  %2428 = vmatprep.subr.bf16.mxu1 %v3096_v0  ;;  %v2714_v12 = vld [vmem:[#allocation6 + $0x20] sm:$0xff]   ;;  %v2709_v13 = vld [vmem:[#allocation2 + $0x38] sm:$0xff]   ;;  %v2715_v15 = vld [vmem:[#allocation6 + $0x28] sm:$0xff]   ;;  %vm220_vm1 = vcmp.ge.s32.totalorder %v3432_v33, 8  ;;  %vm221_vm2 = vcmp.lt.s32.totalorder %v3432_v33, 16  ;;  %vm218_vm3 = vcmp.lt.s32.totalorder %v3432_v33, 8 }
  0xdb   :  { %v230_v14 = vld [vmem:[%s3749_s0] sm:$0xff]  ;;  %v2716_v17 = vld [vmem:[#allocation6 + $0x30] sm:$0xff]   ;;  %vm3437_vm4 = vmand %vm220_vm1, %vm221_vm2  ;;  %vm223_vm5 = vcmp.ge.s32.totalorder %v3432_v33, 16  ;;  %vm224_vm7 = vcmp.lt.s32.totalorder %v3432_v33, 24  ;;  %vm214_vm9 = vcmp.lt.s32.totalorder %v3432_v33, 32  ;;  %vm226_vm10 = vcmp.ge.s32.totalorder %v3432_v33, 24 }
  0xdc   :  { %v247_v16 = vpack.c.bf16 %v230_v14, %v230_v14  ;;  %v2717_v18 = vld [vmem:[#allocation6 + $0x38] sm:$0xff]   ;;  %vm3449_vm8 = vmand %vm223_vm5, %vm224_vm7  ;;  %vm228_vm12 = vcmp.lt.s32.totalorder %v3432_v33, 4  ;;  %v2745_v50 = vld [vmem:[#allocation7 + $0x48] sm:$0xff]  }
  0xdd   :  { %2409 = vmatpush3.bf16.msra.mxu0 %v2703_v2  ;;  %2429 = vmatpush3.bf16.msra.mxu1 %v2711_v6  ;;  %v2193_v19 = vld [vmem:[#allocation4] ss:$0 sm:$0xff]  ;;  %vm3470_vm11 = vmand %vm226_vm10, %vm214_vm9  ;;  %v3496_v59 = vsel %vm228_vm12, 0.0, %v3099_v58 }
  0xde   :  { %2410 = vmatprep.subr.bf16.mxu0 %v3096_v0  ;;  %2430 = vmatprep.subr.bf16.mxu1 %v3096_v0  ;;  %v2202_v26 = vld [vmem:[%s3753_s4] ss:$0 sm:$0xff] }
  0xe1   :  { %2411 = vmatpush3.bf16.msra.mxu0 %v2704_v3  ;;  %2431 = vmatpush3.bf16.msra.mxu1 %v2712_v8 }
  0xe2   :  { %2412 = vmatprep.subr.bf16.mxu0 %v3096_v0  ;;  %2432 = vmatprep.subr.bf16.mxu1 %v3096_v0 }
  0xe5   :  { %2413 = vmatpush3.bf16.msra.mxu0 %v2705_v5  ;;  %2433 = vmatpush3.bf16.msra.mxu1 %v2713_v10 }
  0xe6   :  { %2414 = vmatprep.subr.bf16.mxu0 %v3096_v0  ;;  %2434 = vmatprep.subr.bf16.mxu1 %v3096_v0 }
  0xe9   :  { %2415 = vmatpush3.bf16.msra.mxu0 %v2706_v7  ;;  %2435 = vmatpush3.bf16.msra.mxu1 %v2714_v12 }
  0xea   :  { %2416 = vmatprep.subr.bf16.mxu0 %v3096_v0  ;;  %2436 = vmatprep.subr.bf16.mxu1 %v3096_v0 }
  0xed   :  { %2417 = vmatpush3.bf16.msra.mxu0 %v2707_v9  ;;  %2437 = vmatpush3.bf16.msra.mxu1 %v2715_v15 }
  0xee   :  { %2418 = vmatprep.subr.bf16.mxu0 %v3096_v0  ;;  %2438 = vmatprep.subr.bf16.mxu1 %v3096_v0 }
  0xf1   :  { %2419 = vmatpush3.bf16.msra.mxu0 %v2708_v11  ;;  %2439 = vmatpush3.bf16.msra.mxu1 %v2716_v17 }
  0xf2   :  { %2420 = vmatprep.subr.bf16.mxu0 %v3096_v0  ;;  %2440 = vmatprep.subr.bf16.mxu1 %v3096_v0 }
  0xf5   :  { %2421 = vmatpush3.bf16.msra.mxu0 %v2709_v13  ;;  %2441 = vmatpush3.bf16.msra.mxu1 %v2717_v18 }
  0xf6   :  { %2446 = vmatprep.subr.bf16.mxu0 %v3096_v0  ;;  %2452 = vmatprep.subr.bf16.mxu1 %v3096_v0 }
  0xf8   :  { %2423 = vmatmul.mubr.bf16.vlgmr.msra.gmra.mrb[0].mxu0 %v247_v16 }
  0xf9   :  { %2448 = vmatprep.mubr.msk.bf16.mxu0 %vm3097_vm0, %v3096_v0 }
 0x1cb   :  { %v337_v20 = vpop.f32.mrb[0].mxu0 }
 0x1cc   :  { %v3419_v21 = vadd.f32 %v2193_v19, %v337_v20  ;;  %v2424_v22 = vpop.f32.mrb[1].mxu0 }
 0x1cd   :  { %v340_v23 = vpop.f32.mrb[2].mxu0 }
 0x1ce   :  { %v359_v24 = vpack.c.bf16 %v3419_v21, %v3419_v21  ;;  %v2425_v25 = vpop.f32.mrb[3].mxu0 }
 0x1d0   :  { %2443 = vmatmul.mubr.bf16.vlgmr.msra.gmra.mrb[0].mxu1 %v359_v24 }
 0x1d1   :  { %2454 = vmatprep.mubr.msk.bf16.mxu1 %vm3097_vm0, %v3096_v0 }
 0x2a3   :  { %v449_v27 = vpop.f32.mrb[0].mxu1 }
 0x2a4   :  { %v3428_v28 = vadd.f32 %v2202_v26, %v449_v27  ;;  %v2444_v29 = vpop.f32.mrb[1].mxu1 }
 0x2a5   :  { %v452_v30 = vpop.f32.mrb[2].mxu1 }
 0x2a6   :  { %457 = vrot.lane.b32.xlu0 %v3428_v28, %s3098_s1  ;;  %v2445_v31 = vpop.f32.mrb[3].mxu1  ;;  %v455_v44 = vsel %vm218_vm3, %v3428_v28, 0.0  ;;  %v528_v45 = vsel %vm3437_vm4, %v3428_v28, 0.0  ;;  %v685_v52 = vsel %vm3449_vm8, %v3428_v28, 0.0  ;;  %v796_v56 = vsel %vm3470_vm11, %v3428_v28, 0.0 }
 0x2a7   :  { %v465_v47 = vpack.c.bf16 %v455_v44, %v455_v44  ;;  %v531_v48 = vpack.c.bf16 %v528_v45, %v528_v45  ;;  %v688_v54 = vpack.c.bf16 %v685_v52, %v685_v52  ;;  %v799_v57 = vpack.c.bf16 %v796_v56, %v796_v56 }
 0x318   :  { %v458_v34 = vpop.permute.xlu0 %457 }
 0x319   :  { %v460_v36 = vsel %vm218_vm3, %v458_v34, 0.0  ;;  %v529_v37 = vsel %vm3437_vm4, %v458_v34, 0.0  ;;  %v686_v43 = vsel %vm3449_vm8, %v458_v34, 0.0  ;;  %v797_v51 = vsel %vm3470_vm11, %v458_v34, 0.0 }
 0x31a   :  { %v466_v38 = vpack.c.bf16 %v460_v36, %v460_v36  ;;  %v532_v39 = vpack.c.bf16 %v529_v37, %v529_v37  ;;  %v689_v46 = vpack.c.bf16 %v686_v43, %v686_v43  ;;  %v800_v53 = vpack.c.bf16 %v797_v51, %v797_v51 }
 0x31c   :  { %v472_v40 = vsel %vm467_vm6, %v466_v38, 0  ;;  %v537_v41 = vsel %vm467_vm6, %v532_v39, 0  ;;  %v694_v49 = vsel %vm467_vm6, %v689_v46, 0  ;;  %v805_v55 = vsel %vm467_vm6, %v800_v53, 0  ;;  %v2718_v46 = vld [vmem:[#allocation7] sm:$0xff]  }
 0x31d   :  { %2447 = vmatpush3.bf16.xpose.msra.mxu0 %v472_v40  ;;  %2453 = vmatpush3.bf16.xpose.msra.mxu1 %v537_v41 }
 0x31e   :  { %2470 = vmatprep.subr.bf16.mxu1 %v3096_v0  ;;  %2458 = vmatprep.subr.bf16.mxu0 %v3096_v0 }
 0x324   :  { %2449 = vmatmul.mubr.msk.bf16.vlgmr.msra.gmra.mrb[4].mxu0 %vm467_vm6, %v465_v47  ;;  %2455 = vmatmul.mubr.msk.bf16.vlgmr.msra.gmra.mrb[4].mxu1 %vm467_vm6, %v531_v48 }
 0x325   :  { %2471 = vmatpush3.bf16.xpose.msra.mxu1 %v694_v49  ;;  %2472 = vmatprep.mubr.msk.bf16.mxu1 %vm3097_vm0, %v3096_v0 }
 0x326   :  { %2482 = vmatprep.subr.bf16.mxu1 %v3096_v0  ;;  %2460 = vmatprep.mubr.msk.bf16.mxu0 %vm3097_vm0, %v3096_v0 }
 0x32c   :  { %2473 = vmatmul.mubr.msk.bf16.vlgmr.msra.gmra.mrb[8].mxu1 %vm467_vm6, %v688_v54 }
 0x32d   :  { %2483 = vmatpush3.bf16.xpose.msra.mxu1 %v805_v55  ;;  %2484 = vmatprep.mubr.msk.bf16.mxu1 %vm3097_vm0, %v3096_v0 }
 0x32e   :  { %2494 = vmatprep.subr.bf16.mxu1 %v3096_v0 }
 0x334   :  { %2485 = vmatmul.mubr.msk.bf16.vlgmr.msra.gmra.mrb[12].mxu1 %vm467_vm6, %v799_v57 }
 0x335   :  { %2498 = vmatprep.mubr.msk.bf16.mxu1 %vm3097_vm0, %v3096_v0  ;;  %2495 = vmatpush3.bf16.msra.mxu1 %v2718_v46  ;;  %v2729_v46 = vld [vmem:[%s3760_s11 + $0x8] sm:$0xff]  }
 0x336   :  { %2496 = vmatprep.subr.bf16.mxu1 %v3096_v0 }
 0x3f7   :  { %v508_v60 = vpop.f32.mrb[4].mxu0  ;;  %v573_v61 = vpop.f32.mrb[4].mxu1 }
 0x3f8   :  { %v509_v62 = vadd.f32 %v508_v60, %v3496_v59  ;;  %v574_v63 = vadd.f32 %v573_v61, %v3496_v59  ;;  %v2450_v1 = vpop.f32.mrb[5].mxu0  ;;  %v2456_v2 = vpop.f32.mrb[5].mxu1 }
 0x3f9   :  { %v511_v3 = vpop.f32.mrb[6].mxu0  ;;  %v576_v4 = vpop.f32.mrb[6].mxu1 }
 0x3fa   :  { %v2451_v5 = vpop.f32.mrb[7].mxu0  ;;  %v2457_v6 = vpop.f32.mrb[7].mxu1  ;;  %v579_v7 = vsel %vm514_vm13, %v574_v63, -inf  ;;  %v515_v8 = vsel %vm514_vm13, %v509_v62, -inf }
 0x3fb   :  { %580 = vmax.xlane.f32.xlu0 %v579_v7  ;;  %516 = vmax.xlane.f32.xlu1 %v515_v8 }
 0x3ff   :  { %v730_v9 = vpop.f32.mrb[8].mxu1 }
 0x400   :  { %v731_v10 = vadd.f32 %v730_v9, %v3496_v59  ;;  %v2474_v11 = vpop.f32.mrb[9].mxu1 }
 0x401   :  { %v733_v12 = vpop.f32.mrb[10].mxu1 }
 0x402   :  { %v2475_v13 = vpop.f32.mrb[11].mxu1  ;;  %v736_v14 = vsel %vm514_vm13, %v731_v10, -inf }
 0x403   :  { %737 = vmax.xlane.f32.xlu1 %v736_v14  ;;  %v2719_v14 = vld [vmem:[#allocation7 + $0x8] sm:$0xff]  }
 0x404   :  { %2497 = vmatpush3.bf16.msra.mxu1 %v2719_v14 }
 0x405   :  { %2502 = vmatprep.subr.bf16.mxu1 %v3096_v0 }
 0x407   :  { %v841_v15 = vpop.f32.mrb[12].mxu1 }
 0x408   :  { %v842_v16 = vadd.f32 %v841_v15, %v3496_v59  ;;  %v2486_v17 = vpop.f32.mrb[13].mxu1 }
 0x409   :  { %v844_v18 = vpop.f32.mrb[14].mxu1 }
 0x40a   :  { %v2487_v19 = vpop.f32.mrb[15].mxu1  ;;  %v847_v20 = vsel %vm514_vm13, %v842_v16, -inf }
 0x40b   :  { %848 = vmax.xlane.f32.xlu1 %v847_v20  ;;  %v2219_v20 = vld [vmem:[#allocation9] ss:$0 sm:$0xff] }
 0x488   :  { %v581_v22 = vpop.xlane.xlu0 %580  ;;  %v517_v23 = vpop.xlane.xlu1 %516 }
 0x489   :  { %v582_v24 = vsub.f32 %v574_v63, %v581_v22  ;;  %v518_v25 = vsub.f32 %v509_v62, %v517_v23 }
 0x48b   :  { %v583_v26 = vmul.f32 1.442695, %v582_v24  ;;  %v519_v27 = vmul.f32 1.442695, %v518_v25 }
 0x48d   :  { %2762 = vpow2.f32 %v583_v26 }
 0x48e   :  { %2764 = vpow2.f32 %v519_v27 }
 0x490   :  { %v738_v29 = vpop.xlane.xlu1 %737 }
 0x491   :  { %v739_v30 = vsub.f32 %v731_v10, %v738_v29  ;;  %v2720_v29 = vld [vmem:[#allocation13] sm:$0xff]  }
 0x493   :  { %v740_v31 = vmul.f32 1.442695, %v739_v30  ;;  %v2721_v30 = vld [vmem:[#allocation13 + $0x8] sm:$0xff]  }
 0x495   :  { %2766 = vpow2.f32 %v740_v31 }
 0x497   :  { %v2763_v32 = vpop.eup %2762 }
 0x498   :  { %v585_v34 = vsel %vm514_vm13, %v2763_v32, 0.0  ;;  %v2765_v36 = vpop.eup %2764  ;;  %v849_v40 = vpop.xlane.xlu1 %848 }
 0x499   :  { %586 = vadd.xlane.f32.xlu1 %v585_v34  ;;  %v521_v37 = vsel %vm514_vm13, %v2765_v36, 0.0  ;;  %v850_v41 = vsub.f32 %v842_v16, %v849_v40  ;;  %v3551_v34 = vsel %vm214_vm9, 1.0, %v3096_v0  ;;  %v2724_v40 = vld [vmem:[#allocation13 + $0x20] sm:$0xff]  }
 0x49b   :  { %v851_v43 = vmul.f32 1.442695, %v850_v41  ;;  %v2725_v41 = vld [vmem:[#allocation13 + $0x28] sm:$0xff]  }
 0x49d   :  { %522 = vadd.xlane.f32.xlu1 %v521_v37  ;;  %2768 = vpow2.f32 %v851_v43  ;;  %v2726_v43 = vld [vmem:[#allocation13 + $0x30] sm:$0xff]  }
 0x49f   :  { %v2767_v38 = vpop.eup %2766 }
 0x4a0   :  { %v742_v39 = vsel %vm514_vm13, %v2767_v38, 0.0 }
 0x4a1   :  { %743 = vadd.xlane.f32.xlu0 %v742_v39  ;;  %v2723_v39 = vld [vmem:[#allocation13 + $0x18] sm:$0xff]  }
 0x4a7   :  { %v2769_v44 = vpop.eup %2768 }
 0x4a8   :  { %v853_v45 = vsel %vm514_vm13, %v2769_v44, 0.0 }
 0x4ae   :  { %461 = vrot.lane.b32.xlu1 %v3428_v28, %s3082_s2 }
 0x4d2   :  { %854 = vadd.xlane.f32.xlu1 %v853_v45  ;;  %v2728_v45 = vld [vmem:[%s3760_s11] sm:$0xff]  }
 0x526   :  { %v587_v47 = vpop.xlane.xlu1 %586 }
 0x527   :  { %2770 = vrcp.f32 %v587_v47  ;;  %v2730_v47 = vld [vmem:[%s3760_s11 + $0x10] sm:$0xff]  }
 0x52a   :  { %v523_v48 = vpop.xlane.xlu1 %522 }
 0x52b   :  { %2772 = vrcp.f32 %v523_v48  ;;  %v2731_v48 = vld [vmem:[%s3760_s11 + $0x18] sm:$0xff]  }
 0x52e   :  { %v462_v49 = vpop.permute.xlu1 %461  ;;  %v744_v60 = vpop.xlane.xlu0 %743 }
 0x52f   :  { %v530_v28 = vsel %vm3437_vm4, %v462_v49, 0.0  ;;  %v464_v51 = vsel %vm218_vm3, %v462_v49, 0.0  ;;  %2774 = vrcp.f32 %v744_v60  ;;  %v687_v62 = vsel %vm3449_vm8, %v462_v49, 0.0 }
 0x530   :  { %v591_v52 = vpack.c.bf16 %v530_v28, %v530_v28  ;;  %v527_v56 = vpack.c.bf16 %v464_v51, %v464_v51  ;;  %v748_v1 = vpack.c.bf16 %v687_v62, %v687_v62  ;;  %v798_v5 = vsel %vm3470_vm11, %v462_v49, 0.0  ;;  %v2732_v49 = vld [vmem:[%s3760_s11 + $0x20] sm:$0xff]   ;;  %v2733_v28 = vld [vmem:[%s3760_s11 + $0x28] sm:$0xff]   ;;  %v2734_v62 = vld [vmem:[%s3760_s11 + $0x30] sm:$0xff]  }
 0x531   :  { %v2771_v53 = vpop.eup %2770  ;;  %v859_v7 = vpack.c.bf16 %v798_v5, %v798_v5 }
 0x532   :  { %v589_v54 = vmul.f32 %v2771_v53, %v2763_v32  ;;  %v597_v55 = vsel %vm595_vm14, %v591_v52, 0  ;;  %v643_v58 = vsel %vm595_vm14, %v527_v56, 0  ;;  %v753_v3 = vsel %vm595_vm14, %v748_v1, 0  ;;  %v2225_v1 = vld [vmem:[#allocation15] ss:$0 sm:$0xff] }
 0x533   :  { %2459 = vmatpush3.bf16.msra.mxu0 %v597_v55  ;;  %v864_v9 = vsel %vm595_vm14, %v859_v7, 0  ;;  %v2223_v55 = vld [vmem:[#allocation10] ss:$0 sm:$0xff] }
 0x534   :  { %v590_v57 = vpack.c.bf16 %v589_v54, %v589_v54  ;;  %2464 = vmatprep.subr.bf16.mxu0 %v3096_v0 }
 0x535   :  { %v2773_v61 = vpop.eup %2772 }
 0x536   :  { %2461 = vmatmul.mubr.msk.bf16.vlgmr.msra.gmra.mrb[8].mxu0 %vm514_vm13, %v590_v57  ;;  %v525_v63 = vmul.f32 %v2773_v61, %v2765_v36  ;;  %v2224_v57 = vld [vmem:[#allocation12] ss:$0 sm:$0xff] }
 0x537   :  { %2465 = vmatpush3.bf16.msra.mxu0 %v643_v58  ;;  %2466 = vmatprep.mubr.msk.bf16.mxu0 %vm3097_vm0, %v3096_v0 }
 0x538   :  { %2476 = vmatprep.subr.bf16.mxu0 %v3096_v0  ;;  %v526_v2 = vpack.c.bf16 %v525_v63, %v525_v63  ;;  %v2735_v63 = vld [vmem:[%s3760_s11 + $0x38] sm:$0xff]  }
 0x539   :  { %v2775_v4 = vpop.eup %2774 }
 0x53a   :  { %v746_v6 = vmul.f32 %v2775_v4, %v2767_v38  ;;  %v2722_v38 = vld [vmem:[#allocation13 + $0x10] sm:$0xff]  }
 0x53c   :  { %v747_v8 = vpack.c.bf16 %v746_v6, %v746_v6 }
 0x542   :  { %2467 = vmatmul.mubr.msk.bf16.vlgmr.msra.gmra.mrb[8].mxu0 %vm514_vm13, %v526_v2 }
 0x543   :  { %2477 = vmatpush3.bf16.msra.mxu0 %v753_v3  ;;  %2478 = vmatprep.mubr.msk.bf16.mxu0 %vm3097_vm0, %v3096_v0 }
 0x544   :  { %2488 = vmatprep.subr.bf16.mxu0 %v3096_v0 }
 0x54e   :  { %2479 = vmatmul.mubr.msk.bf16.vlgmr.msra.gmra.mrb[8].mxu0 %vm514_vm13, %v747_v8 }
 0x54f   :  { %2489 = vmatpush3.bf16.msra.mxu0 %v864_v9  ;;  %2490 = vmatprep.mubr.msk.bf16.mxu0 %vm3097_vm0, %v3096_v0  ;;  %v2234_v9 = vld [vmem:[#allocation16] ss:$0 sm:$0xff] }
 0x550   :  { %2522 = vmatprep.subr.bf16.mxu0 %v3096_v0 }
 0x55f   :  { %v855_v10 = vpop.xlane.xlu1 %854 }
 0x560   :  { %2776 = vrcp.f32 %v855_v10 }
 0x56a   :  { %v2777_v11 = vpop.eup %2776 }
 0x56b   :  { %v857_v12 = vmul.f32 %v2777_v11, %v2769_v44  ;;  %v2727_v44 = vld [vmem:[#allocation13 + $0x38] sm:$0xff]  }
 0x56d   :  { %v858_v13 = vpack.c.bf16 %v857_v12, %v857_v12 }
 0x56f   :  { %2491 = vmatmul.mubr.msk.bf16.vlgmr.msra.gmra.mrb[8].mxu0 %vm514_vm13, %v858_v13 }
 0x570   :  { %2538 = vmatprep.mubr.msk.bf16.mxu0 %vm3097_vm0, %v3096_v0  ;;  %2523 = vmatpush3.bf16.msra.mxu0 %v2728_v45 }
 0x571   :  { %2524 = vmatprep.subr.bf16.mxu0 %v3096_v0 }
 0x574   :  { %2525 = vmatpush3.bf16.msra.mxu0 %v2729_v46 }
 0x575   :  { %2526 = vmatprep.subr.bf16.mxu0 %v3096_v0 }
 0x578   :  { %2527 = vmatpush3.bf16.msra.mxu0 %v2730_v47 }
 0x579   :  { %2528 = vmatprep.subr.bf16.mxu0 %v3096_v0 }
 0x57c   :  { %2529 = vmatpush3.bf16.msra.mxu0 %v2731_v48 }
 0x57d   :  { %2530 = vmatprep.subr.bf16.mxu0 %v3096_v0 }
 0x580   :  { %2531 = vmatpush3.bf16.msra.mxu0 %v2732_v49 }
 0x581   :  { %2532 = vmatprep.subr.bf16.mxu0 %v3096_v0 }
 0x584   :  { %2533 = vmatpush3.bf16.msra.mxu0 %v2733_v28 }
 0x585   :  { %2534 = vmatprep.subr.bf16.mxu0 %v3096_v0 }
 0x588   :  { %2535 = vmatpush3.bf16.msra.mxu0 %v2734_v62 }
 0x589   :  { %2536 = vmatprep.subr.bf16.mxu0 %v3096_v0 }
 0x58c   :  { %2537 = vmatpush3.bf16.msra.mxu0 %v2735_v63 }
 0x58d   :  { %2562 = vmatprep.subr.bf16.mxu0 %v3096_v0 }
 0x642   :  { %v900_v15 = vpop.f32.mrb[8].mxu0 }
 0x643   :  { %v911_v16 = vpack.c.bf16 %v900_v15, %v900_v15  ;;  %v2492_v17 = vpop.f32.mrb[9].mxu0 }
 0x644   :  { %v903_v18 = vpop.f32.mrb[10].mxu0  ;;  %v2737_v17 = vld [vmem:[#allocation6 + $0x48] sm:$0xff]  }
 0x645   :  { %v2493_v19 = vpop.f32.mrb[11].mxu0  ;;  %2499 = vmatmul.mubr.msk.bf16.vlgmr.msra.gmra.mrb[16].mxu1 %vm467_vm6, %v911_v16  ;;  %v2736_v16 = vld [vmem:[#allocation6 + $0x40] sm:$0xff]  }
 0x646   :  { %2518 = vmatprep.mubr.msk.bf16.mxu1 %vm3097_vm0, %v3096_v0  ;;  %2503 = vmatpush3.bf16.msra.mxu1 %v2720_v29  ;;  %v2742_v29 = vld [vmem:[#allocation6 + $0x70] sm:$0xff]  }
 0x647   :  { %2504 = vmatprep.subr.bf16.mxu1 %v3096_v0 }
 0x64a   :  { %2505 = vmatpush3.bf16.msra.mxu1 %v2721_v30  ;;  %v2743_v30 = vld [vmem:[#allocation6 + $0x78] sm:$0xff]  }
 0x64b   :  { %2506 = vmatprep.subr.bf16.mxu1 %v3096_v0 }
 0x64e   :  { %2507 = vmatpush3.bf16.msra.mxu1 %v2722_v38 }
 0x64f   :  { %2508 = vmatprep.subr.bf16.mxu1 %v3096_v0 }
 0x652   :  { %2509 = vmatpush3.bf16.msra.mxu1 %v2723_v39  ;;  %v2244_v39 = vld [vmem:[#allocation19] ss:$0 sm:$0xff] }
 0x653   :  { %2510 = vmatprep.subr.bf16.mxu1 %v3096_v0 }
 0x656   :  { %2511 = vmatpush3.bf16.msra.mxu1 %v2724_v40 }
 0x657   :  { %2512 = vmatprep.subr.bf16.mxu1 %v3096_v0 }
 0x65a   :  { %2513 = vmatpush3.bf16.msra.mxu1 %v2725_v41 }
 0x65b   :  { %2514 = vmatprep.subr.bf16.mxu1 %v3096_v0 }
 0x65e   :  { %2515 = vmatpush3.bf16.msra.mxu1 %v2726_v43 }
 0x65f   :  { %2516 = vmatprep.subr.bf16.mxu1 %v3096_v0 }
 0x662   :  { %2517 = vmatpush3.bf16.msra.mxu1 %v2727_v44  ;;  %v2246_v44 = vld [vmem:[%s3753_s4 + $0x1] ss:$0 sm:$0xff] }
 0x663   :  { %2542 = vmatprep.subr.bf16.mxu1 %v3096_v0 }
 0x718   :  { %v968_v22 = vpop.f32.mrb[16].mxu1 }
 0x719   :  { %v969_v23 = vadd.f32 %v2219_v20, %v968_v22  ;;  %v2500_v24 = vpop.f32.mrb[17].mxu1 }
 0x71a   :  { %v971_v25 = vpop.f32.mrb[18].mxu1  ;;  %v2738_v24 = vld [vmem:[#allocation6 + $0x50] sm:$0xff]  }
 0x71b   :  { %v2501_v26 = vpop.f32.mrb[19].mxu1  ;;  %v974_v27 = vadd.f32 %v969_v23, %v3419_v21  ;;  %v2739_v25 = vld [vmem:[#allocation6 + $0x58] sm:$0xff]  }
 0x71c   :  { %v2740_v26 = vld [vmem:[#allocation6 + $0x60] sm:$0xff]  }
 0x71d   :  { %977 = vadd.xlane.f32.xlu0 %v974_v27 }
 0x7aa   :  { %v978_v31 = vpop.xlane.xlu0 %977 }
 0x7ab   :  { %v979_v32 = vmul.f32 0.03125, %v978_v31 }
 0x7ad   :  { %v980_v36 = vsub.f32 %v974_v27, %v979_v32  ;;  %v2741_v27 = vld [vmem:[#allocation6 + $0x68] sm:$0xff]  }
 0x7af   :  { %v981_v37 = vmul.f32 %v3551_v34, %v980_v36 }
 0x7b1   :  { %v982_v21 = vmul.f32 %v981_v37, %v981_v37 }
 0x7b3   :  { %983 = vadd.xlane.f32.xlu0 %v982_v21  ;;  %v2243_v21 = vld [vmem:[#allocation18] ss:$0 sm:$0xff] }
 0x840   :  { %v984_v51 = vpop.xlane.xlu0 %983 }
 0x841   :  { %v985_v52 = vmul.f32 0.03125, %v984_v51 }
 0x843   :  { %v986_v53 = vadd.f32 1e-05, %v985_v52 }
 0x845   :  { %2778 = vrsqrt.f32 %v986_v53 }
 0x84f   :  { %v2779_v54 = vpop.eup %2778 }
 0x850   :  { %v988_v56 = vmul.f32 %v2779_v54, %v981_v37 }
 0x852   :  { %v995_v58 = vmul.f32 %v2223_v55, %v988_v56 }
 0x854   :  { %v1002_v60 = vadd.f32 %v2224_v57, %v995_v58 }
 0x856   :  { %v1019_v61 = vpack.c.bf16 %v1002_v60, %v1002_v60 }
 0x858   :  { %2519 = vmatmul.mubr.bf16.vlgmr.msra.gmra.mrb[20].mxu1 %v1019_v61 }
 0x859   :  { %2558 = vmatprep.mubr.msk.bf16.mxu1 %vm3097_vm0, %v3096_v0  ;;  %2543 = vmatpush3.bf16.msra.mxu1 %v2736_v16 }
 0x85a   :  { %2544 = vmatprep.subr.bf16.mxu1 %v3096_v0 }
 0x85d   :  { %2545 = vmatpush3.bf16.msra.mxu1 %v2737_v17 }
 0x85e   :  { %2546 = vmatprep.subr.bf16.mxu1 %v3096_v0 }
 0x861   :  { %2547 = vmatpush3.bf16.msra.mxu1 %v2738_v24 }
 0x862   :  { %2548 = vmatprep.subr.bf16.mxu1 %v3096_v0 }
 0x865   :  { %2549 = vmatpush3.bf16.msra.mxu1 %v2739_v25 }
 0x866   :  { %2550 = vmatprep.subr.bf16.mxu1 %v3096_v0 }
 0x869   :  { %2551 = vmatpush3.bf16.msra.mxu1 %v2740_v26 }
 0x86a   :  { %2552 = vmatprep.subr.bf16.mxu1 %v3096_v0 }
 0x86d   :  { %2553 = vmatpush3.bf16.msra.mxu1 %v2741_v27 }
 0x86e   :  { %2554 = vmatprep.subr.bf16.mxu1 %v3096_v0 }
 0x871   :  { %2555 = vmatpush3.bf16.msra.mxu1 %v2742_v29 }
 0x872   :  { %2556 = vmatprep.subr.bf16.mxu1 %v3096_v0 }
 0x875   :  { %2557 = vmatpush3.bf16.msra.mxu1 %v2743_v30 }
 0x876   :  { %2586 = vmatprep.subr.bf16.mxu1 %v3096_v0 }
 0x92b   :  { %v1109_v2 = vpop.f32.mrb[20].mxu1 }
 0x92c   :  { %v1110_v3 = vadd.f32 %v2225_v1, %v1109_v2  ;;  %v2520_v4 = vpop.f32.mrb[21].mxu1 }
 0x92d   :  { %v1112_v5 = vpop.f32.mrb[22].mxu1 }
 0x92e   :  { %v1115_v6 = vmax.f32 %v1110_v3, 0.0  ;;  %v2521_v7 = vpop.f32.mrb[23].mxu1 }
 0x930   :  { %v1132_v8 = vpack.c.bf16 %v1115_v6, %v1115_v6 }
 0x932   :  { %2539 = vmatmul.mubr.bf16.vlgmr.msra.gmra.mrb[12].mxu0 %v1132_v8 }
 0x933   :  { %2564 = vmatprep.mubr.msk.bf16.mxu0 %vm3097_vm0, %v3096_v0 }
 0xa05   :  { %v1222_v10 = vpop.f32.mrb[12].mxu0 }
 0xa06   :  { %v1223_v11 = vadd.f32 %v2234_v9, %v1222_v10  ;;  %v2540_v12 = vpop.f32.mrb[13].mxu0 }
 0xa07   :  { %v1225_v13 = vpop.f32.mrb[14].mxu0 }
 0xa08   :  { %v2541_v14 = vpop.f32.mrb[15].mxu0  ;;  %v1228_v15 = vadd.f32 %v1223_v11, %v1002_v60 }
 0xa0a   :  { %1231 = vadd.xlane.f32.xlu0 %v1228_v15 }
 0xa97   :  { %v1232_v18 = vpop.xlane.xlu0 %1231 }
 0xa98   :  { %v1233_v19 = vmul.f32 0.03125, %v1232_v18 }
 0xa9a   :  { %v1234_v20 = vsub.f32 %v1228_v15, %v1233_v19 }
 0xa9c   :  { %v1235_v22 = vmul.f32 %v3551_v34, %v1234_v20 }
 0xa9e   :  { %v1236_v23 = vmul.f32 %v1235_v22, %v1235_v22 }
 0xaa0   :  { %1237 = vadd.xlane.f32.xlu0 %v1236_v23 }
 0xb2d   :  { %v1238_v31 = vpop.xlane.xlu0 %1237 }
 0xb2e   :  { %v1239_v32 = vmul.f32 0.03125, %v1238_v31 }
 0xb30   :  { %v1240_v36 = vadd.f32 1e-05, %v1239_v32 }
 0xb32   :  { %2780 = vrsqrt.f32 %v1240_v36 }
 0xb3c   :  { %v2781_v37 = vpop.eup %2780 }
 0xb3d   :  { %v1242_v38 = vmul.f32 %v2781_v37, %v1235_v22 }
 0xb3f   :  { %v1249_v40 = vmul.f32 %v2243_v21, %v1242_v38 }
 0xb41   :  { %v3605_v41 = vadd.f32 %v2244_v39, %v1249_v40 }
 0xb43   :  { %v1274_v43 = vpack.c.bf16 %v3605_v41, %v3605_v41 }
 0xb45   :  { %2559 = vmatmul.mubr.bf16.vlgmr.msra.gmra.mrb[24].mxu1 %v1274_v43 }
 0xb46   :  { %2588 = vmatprep.mubr.msk.bf16.mxu1 %vm3097_vm0, %v3096_v0 }
 0xc18   :  { %v1365_v45 = vpop.f32.mrb[24].mxu1 }
 0xc19   :  { %v3614_v46 = vadd.f32 %v2246_v44, %v1365_v45  ;;  %v2560_v47 = vpop.f32.mrb[25].mxu1 }
 0xc1a   :  { %v1368_v48 = vpop.f32.mrb[26].mxu1 }
 0xc1b   :  { %1373 = vrot.lane.b32.xlu0 %v3614_v46, %s3098_s1  ;;  %v2561_v49 = vpop.f32.mrb[27].mxu1  ;;  %v1371_v60 = vsel %vm218_vm3, %v3614_v46, 0.0  ;;  %v1598_v61 = vsel %vm3449_vm8, %v3614_v46, 0.0  ;;  %v1442_v5 = vsel %vm3437_vm4, %v3614_v46, 0.0  ;;  %v1709_v6 = vsel %vm3470_vm11, %v3614_v46, 0.0 }
 0xc1c   :  { %v1381_v1 = vpack.c.bf16 %v1371_v60, %v1371_v60  ;;  %v1601_v2 = vpack.c.bf16 %v1598_v61, %v1598_v61  ;;  %v1445_v7 = vpack.c.bf16 %v1442_v5, %v1442_v5  ;;  %v1712_v8 = vpack.c.bf16 %v1709_v6, %v1709_v6  ;;  %v2744_v60 = vld [vmem:[#allocation7 + $0x40] sm:$0xff]  }
 0xc8d   :  { %v1374_v28 = vpop.permute.xlu0 %1373 }
 0xc8e   :  { %v1376_v51 = vsel %vm218_vm3, %v1374_v28, 0.0  ;;  %v1599_v52 = vsel %vm3449_vm8, %v1374_v28, 0.0  ;;  %v1443_v57 = vsel %vm3437_vm4, %v1374_v28, 0.0  ;;  %v1710_v58 = vsel %vm3470_vm11, %v1374_v28, 0.0 }
 0xc8f   :  { %v1382_v53 = vpack.c.bf16 %v1376_v51, %v1376_v51  ;;  %v1602_v54 = vpack.c.bf16 %v1599_v52, %v1599_v52  ;;  %v1446_v62 = vpack.c.bf16 %v1443_v57, %v1443_v57  ;;  %v1713_v63 = vpack.c.bf16 %v1710_v58, %v1710_v58 }
 0xc91   :  { %v1387_v55 = vsel %vm467_vm6, %v1382_v53, 0  ;;  %v1607_v56 = vsel %vm467_vm6, %v1602_v54, 0  ;;  %v1451_v3 = vsel %vm467_vm6, %v1446_v62, 0  ;;  %v1718_v4 = vsel %vm467_vm6, %v1713_v63, 0 }
 0xc92   :  { %2563 = vmatpush3.bf16.xpose.msra.mxu0 %v1387_v55  ;;  %2587 = vmatpush3.bf16.xpose.msra.mxu1 %v1607_v56 }
 0xc93   :  { %2568 = vmatprep.subr.bf16.mxu0 %v3096_v0  ;;  %2598 = vmatprep.subr.bf16.mxu1 %v3096_v0 }
 0xc99   :  { %2565 = vmatmul.mubr.msk.bf16.vlgmr.msra.gmra.mrb[16].mxu0 %vm467_vm6, %v1381_v1  ;;  %2589 = vmatmul.mubr.msk.bf16.vlgmr.msra.gmra.mrb[28].mxu1 %vm467_vm6, %v1601_v2 }
 0xc9a   :  { %2569 = vmatpush3.bf16.xpose.msra.mxu0 %v1451_v3  ;;  %2599 = vmatpush3.bf16.xpose.msra.mxu1 %v1718_v4 }
 0xc9b   :  { %2570 = vmatprep.mubr.msk.bf16.mxu0 %vm3097_vm0, %v3096_v0  ;;  %2600 = vmatprep.mubr.msk.bf16.mxu1 %vm3097_vm0, %v3096_v0 }
 0xc9c   :  { %2574 = vmatprep.subr.bf16.mxu0 %v3096_v0  ;;  %2610 = vmatprep.subr.bf16.mxu1 %v3096_v0 }
 0xca1   :  { %2571 = vmatmul.mubr.msk.bf16.vlgmr.msra.gmra.mrb[20].mxu0 %vm467_vm6, %v1445_v7  ;;  %2601 = vmatmul.mubr.msk.bf16.vlgmr.msra.gmra.mrb[32].mxu1 %vm467_vm6, %v1712_v8 }
 0xca2   :  { %2576 = vmatprep.mubr.msk.bf16.mxu0 %vm3097_vm0, %v3096_v0  ;;  %2614 = vmatprep.mubr.msk.bf16.mxu1 %vm3097_vm0, %v3096_v0 }
 0xca3   :  { %2611 = vmatpush3.bf16.msra.mxu1 %v2744_v60 }
 0xca4   :  { %2612 = vmatprep.subr.bf16.mxu1 %v3096_v0 }
 0xca7   :  { %2613 = vmatpush3.bf16.msra.mxu1 %v2745_v50 }
 0xca8   :  { %2638 = vmatprep.subr.bf16.mxu1 %v3096_v0 }
 0xd6c   :  { %v1423_v9 = vpop.f32.mrb[16].mxu0  ;;  %v1643_v10 = vpop.f32.mrb[28].mxu1 }
 0xd6d   :  { %v1424_v11 = vadd.f32 %v1423_v9, %v3496_v59  ;;  %v2566_v12 = vpop.f32.mrb[17].mxu0  ;;  %v2590_v13 = vpop.f32.mrb[29].mxu1  ;;  %v1644_v27 = vadd.f32 %v1643_v10, %v3496_v59 }
 0xd6e   :  { %v1426_v14 = vpop.f32.mrb[18].mxu0  ;;  %v1646_v15 = vpop.f32.mrb[30].mxu1 }
 0xd6f   :  { %v2567_v16 = vpop.f32.mrb[19].mxu0  ;;  %v2591_v17 = vpop.f32.mrb[31].mxu1  ;;  %v1429_v18 = vsel %vm514_vm13, %v1424_v11, -inf  ;;  %v1649_v36 = vsel %vm514_vm13, %v1644_v27, -inf }
 0xd70   :  { %1430 = vmax.xlane.f32.xlu0 %v1429_v18 }
 0xd74   :  { %v1487_v19 = vpop.f32.mrb[20].mxu0  ;;  %v1754_v20 = vpop.f32.mrb[32].mxu1 }
 0xd75   :  { %v1488_v22 = vadd.f32 %v1487_v19, %v3496_v59  ;;  %v2572_v23 = vpop.f32.mrb[21].mxu0  ;;  %v2602_v24 = vpop.f32.mrb[33].mxu1  ;;  %v1755_v32 = vadd.f32 %v1754_v20, %v3496_v59 }
 0xd76   :  { %v1490_v25 = vpop.f32.mrb[22].mxu0  ;;  %v1757_v26 = vpop.f32.mrb[34].mxu1 }
 0xd77   :  { %v2573_v29 = vpop.f32.mrb[23].mxu0  ;;  %v2603_v30 = vpop.f32.mrb[35].mxu1  ;;  %v1493_v31 = vsel %vm514_vm13, %v1488_v22, -inf  ;;  %v1760_v37 = vsel %vm514_vm13, %v1755_v32, -inf }
 0xd78   :  { %1494 = vmax.xlane.f32.xlu1 %v1493_v31  ;;  %v2263_v30 = vld [vmem:[#allocation9 + $0x1] ss:$0 sm:$0xff] }
 0xd7c   :  { %1650 = vmax.xlane.f32.xlu1 %v1649_v36 }
 0xd80   :  { %1761 = vmax.xlane.f32.xlu1 %v1760_v37 }
 0xdfd   :  { %v1431_v21 = vpop.xlane.xlu0 %1430 }
 0xdfe   :  { %v1432_v38 = vsub.f32 %v1424_v11, %v1431_v21 }
 0xe00   :  { %v1433_v39 = vmul.f32 1.442695, %v1432_v38 }
 0xe02   :  { %2782 = vpow2.f32 %v1433_v39  ;;  %v2746_v39 = vld [vmem:[#allocation13 + $0x40] sm:$0xff]  }
 0xe05   :  { %v1495_v40 = vpop.xlane.xlu1 %1494 }
 0xe06   :  { %v1496_v43 = vsub.f32 %v1488_v22, %v1495_v40  ;;  %v2747_v40 = vld [vmem:[#allocation13 + $0x48] sm:$0xff]  }
 0xe08   :  { %v1497_v44 = vmul.f32 1.442695, %v1496_v43 }
 0xe09   :  { %v1651_v45 = vpop.xlane.xlu1 %1650 }
 0xe0a   :  { %2784 = vpow2.f32 %v1497_v44  ;;  %v1652_v47 = vsub.f32 %v1644_v27, %v1651_v45 }
 0xe0c   :  { %v2783_v48 = vpop.eup %2782  ;;  %v1653_v49 = vmul.f32 1.442695, %v1652_v47 }
 0xe0d   :  { %v1435_v59 = vsel %vm514_vm13, %v2783_v48, 0.0  ;;  %v1762_v54 = vpop.xlane.xlu1 %1761 }
 0xe0e   :  { %2786 = vpow2.f32 %v1653_v49  ;;  %1436 = vadd.xlane.f32.xlu1 %v1435_v59  ;;  %v1763_v55 = vsub.f32 %v1755_v32, %v1762_v54  ;;  %v2748_v49 = vld [vmem:[#allocation13 + $0x50] sm:$0xff]   ;;  %v2750_v59 = vld [vmem:[#allocation13 + $0x60] sm:$0xff]  }
 0xe0f   :  { %v2755_v54 = vld [vmem:[%s3760_s11 + $0x48] sm:$0xff]  }
 0xe10   :  { %v1764_v56 = vmul.f32 1.442695, %v1763_v55  ;;  %v2756_v55 = vld [vmem:[%s3760_s11 + $0x50] sm:$0xff]  }
 0xe12   :  { %2788 = vpow2.f32 %v1764_v56  ;;  %v2757_v56 = vld [vmem:[%s3760_s11 + $0x58] sm:$0xff]  }
 0xe14   :  { %v2785_v28 = vpop.eup %2784 }
 0xe15   :  { %v1499_v51 = vsel %vm514_vm13, %v2785_v28, 0.0 }
 0xe16   :  { %1500 = vadd.xlane.f32.xlu1 %v1499_v51  ;;  %v2752_v51 = vld [vmem:[#allocation13 + $0x70] sm:$0xff]  }
 0xe18   :  { %v2787_v52 = vpop.eup %2786 }
 0xe19   :  { %v1655_v53 = vsel %vm514_vm13, %v2787_v52, 0.0 }
 0xe1a   :  { %1656 = vadd.xlane.f32.xlu0 %v1655_v53  ;;  %v2754_v53 = vld [vmem:[%s3760_s11 + $0x40] sm:$0xff]  }
 0xe1c   :  { %v2789_v57 = vpop.eup %2788 }
 0xe1d   :  { %v1766_v58 = vsel %vm514_vm13, %v2789_v57, 0.0 }
 0xe27   :  { %1377 = vrot.lane.b32.xlu1 %v3614_v46, %s3082_s2 }
 0xe4b   :  { %1767 = vadd.xlane.f32.xlu1 %v1766_v58  ;;  %v2759_v58 = vld [vmem:[%s3760_s11 + $0x68] sm:$0xff]  }
 0xe9b   :  { %v1437_v61 = vpop.xlane.xlu1 %1436 }
 0xea3   :  { %v1501_v62 = vpop.xlane.xlu1 %1500 }
 0xea4   :  { %2790 = vrcp.f32 %v1501_v62 }
 0xea5   :  { %2792 = vrcp.f32 %v1437_v61 }
 0xea7   :  { %v1378_v63 = vpop.permute.xlu1 %1377  ;;  %v1657_v35 = vpop.xlane.xlu0 %1656 }
 0xea8   :  { %v1444_v1 = vsel %vm3437_vm4, %v1378_v63, 0.0  ;;  %v1380_v3 = vsel %vm218_vm3, %v1378_v63, 0.0  ;;  %2794 = vrcp.f32 %v1657_v35  ;;  %v1600_v33 = vsel %vm3449_vm8, %v1378_v63, 0.0 }
 0xea9   :  { %v1505_v46 = vpack.c.bf16 %v1444_v1, %v1444_v1  ;;  %v1441_v6 = vpack.c.bf16 %v1380_v3, %v1380_v3  ;;  %v1661_v11 = vpack.c.bf16 %v1600_v33, %v1600_v33  ;;  %v1711_v15 = vsel %vm3470_vm11, %v1378_v63, 0.0  ;;  %v2267_v1 = vld [vmem:[#allocation10 + $0x1] ss:$0 sm:$0xff] }
 0xeaa   :  { %v1772_v42 = vpack.c.bf16 %v1711_v15, %v1711_v15 }
 0xeab   :  { %v1510_v2 = vsel %vm595_vm14, %v1505_v46, 0  ;;  %v1556_v8 = vsel %vm595_vm14, %v1441_v6, 0  ;;  %v1666_v13 = vsel %vm595_vm14, %v1661_v11, 0  ;;  %v2760_v6 = vld [vmem:[%s3760_s11 + $0x70] sm:$0xff]  }
 0xeac   :  { %2575 = vmatpush3.bf16.msra.mxu0 %v1510_v2  ;;  %v1777_v18 = vsel %vm595_vm14, %v1772_v42, 0  ;;  %v2268_v2 = vld [vmem:[#allocation12 + $0x1] ss:$0 sm:$0xff] }
 0xead   :  { %2580 = vmatprep.subr.bf16.mxu0 %v3096_v0 }
 0xeae   :  { %v2791_v4 = vpop.eup %2790 }
 0xeaf   :  { %v1503_v5 = vmul.f32 %v2791_v4, %v2785_v28  ;;  %v2793_v9 = vpop.eup %2792  ;;  %v2751_v28 = vld [vmem:[#allocation13 + $0x68] sm:$0xff]  }
 0xeb0   :  { %v1439_v10 = vmul.f32 %v2793_v9, %v2783_v48 }
 0xeb1   :  { %v1504_v7 = vpack.c.bf16 %v1503_v5, %v1503_v5 }
 0xeb2   :  { %v1440_v12 = vpack.c.bf16 %v1439_v10, %v1439_v10  ;;  %v2795_v14 = vpop.eup %2794 }
 0xeb3   :  { %2577 = vmatmul.mubr.msk.bf16.vlgmr.msra.gmra.mrb[24].mxu0 %vm514_vm13, %v1504_v7  ;;  %v1659_v16 = vmul.f32 %v2795_v14, %v2787_v52  ;;  %v2753_v52 = vld [vmem:[#allocation13 + $0x78] sm:$0xff]   ;;  %v2761_v7 = vld [vmem:[%s3760_s11 + $0x78] sm:$0xff]   ;;  %v2294_v14 = vld [vmem:[#allocation16 + $0x1] ss:$0 sm:$0xff] }
 0xeb4   :  { %2581 = vmatpush3.bf16.msra.mxu0 %v1556_v8  ;;  %2582 = vmatprep.mubr.msk.bf16.mxu0 %vm3097_vm0, %v3096_v0  ;;  %v2269_v8 = vld [vmem:[#allocation15 + $0x1] ss:$0 sm:$0xff] }
 0xeb5   :  { %2592 = vmatprep.subr.bf16.mxu0 %v3096_v0  ;;  %v1660_v17 = vpack.c.bf16 %v1659_v16, %v1659_v16 }
 0xebf   :  { %2583 = vmatmul.mubr.msk.bf16.vlgmr.msra.gmra.mrb[24].mxu0 %vm514_vm13, %v1440_v12 }
 0xec0   :  { %2593 = vmatpush3.bf16.msra.mxu0 %v1666_v13  ;;  %2594 = vmatprep.mubr.msk.bf16.mxu0 %vm3097_vm0, %v3096_v0 }
 0xec1   :  { %2604 = vmatprep.subr.bf16.mxu0 %v3096_v0 }
 0xecb   :  { %2595 = vmatmul.mubr.msk.bf16.vlgmr.msra.gmra.mrb[24].mxu0 %vm514_vm13, %v1660_v17 }
 0xecc   :  { %2605 = vmatpush3.bf16.msra.mxu0 %v1777_v18  ;;  %2606 = vmatprep.mubr.msk.bf16.mxu0 %vm3097_vm0, %v3096_v0 }
 0xecd   :  { %2618 = vmatprep.subr.bf16.mxu0 %v3096_v0 }
 0xed8   :  { %v1768_v19 = vpop.xlane.xlu1 %1767 }
 0xed9   :  { %2796 = vrcp.f32 %v1768_v19 }
 0xee3   :  { %v2797_v20 = vpop.eup %2796 }
 0xee4   :  { %v1770_v22 = vmul.f32 %v2797_v20, %v2789_v57  ;;  %v2758_v57 = vld [vmem:[%s3760_s11 + $0x60] sm:$0xff]  }
 0xee6   :  { %v1771_v23 = vpack.c.bf16 %v1770_v22, %v1770_v22 }
 0xee8   :  { %2607 = vmatmul.mubr.msk.bf16.vlgmr.msra.gmra.mrb[24].mxu0 %vm514_vm13, %v1771_v23 }
 0xee9   :  { %2634 = vmatprep.mubr.msk.bf16.mxu0 %vm3097_vm0, %v3096_v0  ;;  %2619 = vmatpush3.bf16.msra.mxu0 %v2746_v39 }
 0xeea   :  { %2620 = vmatprep.subr.bf16.mxu0 %v3096_v0 }
 0xeed   :  { %2621 = vmatpush3.bf16.msra.mxu0 %v2747_v40 }
 0xeee   :  { %2622 = vmatprep.subr.bf16.mxu0 %v3096_v0 }
 0xef1   :  { %2623 = vmatpush3.bf16.msra.mxu0 %v2748_v49 }
 0xef2   :  { %2624 = vmatprep.subr.bf16.mxu0 %v3096_v0 }
 0xfbb   :  { %v1813_v24 = vpop.f32.mrb[24].mxu0 }
 0xfbc   :  { %v1825_v25 = vpack.c.bf16 %v1813_v24, %v1813_v24  ;;  %v2608_v26 = vpop.f32.mrb[25].mxu0 }
 0xfbd   :  { %v1816_v27 = vpop.f32.mrb[26].mxu0 }
 0xfbe   :  { %v2609_v29 = vpop.f32.mrb[27].mxu0  ;;  %2615 = vmatmul.mubr.msk.bf16.vlgmr.msra.gmra.mrb[36].mxu1 %vm467_vm6, %v1825_v25 }
 0xfbf   :  { %2654 = vmatprep.mubr.msk.bf16.mxu1 %vm3097_vm0, %v3096_v0  ;;  %2639 = vmatpush3.bf16.msra.mxu1 %v2754_v53  ;;  %v2303_v29 = vld [vmem:[#allocation18 + $0x1] ss:$0 sm:$0xff] }
 0xfc0   :  { %2640 = vmatprep.subr.bf16.mxu1 %v3096_v0 }
 0xfc3   :  { %2641 = vmatpush3.bf16.msra.mxu1 %v2755_v54 }
 0xfc4   :  { %2642 = vmatprep.subr.bf16.mxu1 %v3096_v0 }
 0xfc7   :  { %2643 = vmatpush3.bf16.msra.mxu1 %v2756_v55 }
 0xfc8   :  { %2644 = vmatprep.subr.bf16.mxu1 %v3096_v0 }
 0xfcb   :  { %2645 = vmatpush3.bf16.msra.mxu1 %v2757_v56 }
 0xfcc   :  { %2646 = vmatprep.subr.bf16.mxu1 %v3096_v0 }
 0xfcf   :  { %2647 = vmatpush3.bf16.msra.mxu1 %v2758_v57 }
 0xfd0   :  { %2648 = vmatprep.subr.bf16.mxu1 %v3096_v0 }
 0xfd3   :  { %2649 = vmatpush3.bf16.msra.mxu1 %v2759_v58 }
 0xfd4   :  { %2650 = vmatprep.subr.bf16.mxu1 %v3096_v0 }
 0xfd7   :  { %2651 = vmatpush3.bf16.msra.mxu1 %v2760_v6 }
 0xfd8   :  { %2652 = vmatprep.subr.bf16.mxu1 %v3096_v0 }
 0xfdb   :  { %2653 = vmatpush3.bf16.msra.mxu1 %v2761_v7 }
0x1091   :  { %v1883_v31 = vpop.f32.mrb[36].mxu1 }
0x1092   :  { %v1884_v32 = vadd.f32 %v2263_v30, %v1883_v31  ;;  %v2616_v36 = vpop.f32.mrb[37].mxu1  ;;  %v2304_v31 = vld [vmem:[#allocation19 + $0x1] ss:$0 sm:$0xff] }
0x1093   :  { %v1886_v37 = vpop.f32.mrb[38].mxu1 }
0x1094   :  { %v2617_v21 = vpop.f32.mrb[39].mxu1  ;;  %v1889_v38 = vadd.f32 %v1884_v32, %v3605_v41  ;;  %v2749_v41 = vld [vmem:[#allocation13 + $0x58] sm:$0xff]  }
0x1095   :  { %2625 = vmatpush3.bf16.msra.mxu0 %v2749_v41 }
0x1096   :  { %1894 = vadd.xlane.f32.xlu0 %v1889_v38  ;;  %2626 = vmatprep.subr.bf16.mxu0 %v3096_v0 }
0x1099   :  { %2627 = vmatpush3.bf16.msra.mxu0 %v2750_v59 }
0x109a   :  { %2628 = vmatprep.subr.bf16.mxu0 %v3096_v0 }
0x109d   :  { %2629 = vmatpush3.bf16.msra.mxu0 %v2751_v28 }
0x109e   :  { %2630 = vmatprep.subr.bf16.mxu0 %v3096_v0 }
0x10a1   :  { %2631 = vmatpush3.bf16.msra.mxu0 %v2752_v51 }
0x10a2   :  { %2632 = vmatprep.subr.bf16.mxu0 %v3096_v0 }
0x10a5   :  { %2633 = vmatpush3.bf16.msra.mxu0 %v2753_v52 }
0x1123   :  { %v1895_v43 = vpop.xlane.xlu0 %1894 }
0x1124   :  { %v1896_v44 = vmul.f32 0.03125, %v1895_v43 }
0x1126   :  { %v1897_v45 = vsub.f32 %v1889_v38, %v1896_v44 }
0x1128   :  { %v1898_v47 = vmul.f32 %v3551_v34, %v1897_v45 }
0x112a   :  { %v1899_v48 = vmul.f32 %v1898_v47, %v1898_v47 }
0x112c   :  { %1900 = vadd.xlane.f32.xlu0 %v1899_v48 }
0x11b9   :  { %v1901_v60 = vpop.xlane.xlu0 %1900 }
0x11ba   :  { %v1902_v61 = vmul.f32 0.03125, %v1901_v60 }
0x11bc   :  { %v1903_v62 = vadd.f32 1e-05, %v1902_v61 }
0x11be   :  { %2798 = vrsqrt.f32 %v1903_v62 }
0x11c8   :  { %v2799_v63 = vpop.eup %2798 }
0x11c9   :  { %v1905_v46 = vmul.f32 %v2799_v63, %v1898_v47 }
0x11cb   :  { %v1912_v3 = vmul.f32 %v2267_v1, %v1905_v46 }
0x11cd   :  { %v1919_v4 = vadd.f32 %v2268_v2, %v1912_v3 }
0x11cf   :  { %v1937_v5 = vpack.c.bf16 %v1919_v4, %v1919_v4 }
0x11d1   :  { %2635 = vmatmul.mubr.bf16.vlgmr.msra.gmra.mrb[28].mxu0 %v1937_v5 }
0x12a4   :  { %v2028_v35 = vpop.f32.mrb[28].mxu0 }
0x12a5   :  { %v2029_v9 = vadd.f32 %v2269_v8, %v2028_v35  ;;  %v2636_v33 = vpop.f32.mrb[29].mxu0 }
0x12a6   :  { %v2031_v10 = vpop.f32.mrb[30].mxu0 }
0x12a7   :  { %v2034_v11 = vmax.f32 %v2029_v9, 0.0  ;;  %v2637_v12 = vpop.f32.mrb[31].mxu0 }
0x12a9   :  { %v2052_v13 = vpack.c.bf16 %v2034_v11, %v2034_v11 }
0x12ab   :  { %2655 = vmatmul.mubr.bf16.vlgmr.msra.gmra.mrb[40].mxu1 %v2052_v13 }
0x137e   :  { %v2143_v15 = vpop.f32.mrb[40].mxu1 }
0x137f   :  { %v2144_v16 = vadd.f32 %v2294_v14, %v2143_v15  ;;  %v2656_v42 = vpop.f32.mrb[41].mxu1 }
0x1380   :  { %v2146_v17 = vpop.f32.mrb[42].mxu1 }
0x1381   :  { %v2657_v0 = vpop.f32.mrb[43].mxu1  ;;  %v2149_v18 = vadd.f32 %v2144_v16, %v1919_v4 }
0x1383   :  { %2154 = vadd.xlane.f32.xlu0 %v2149_v18 }
0x1410   :  { %v2155_v19 = vpop.xlane.xlu0 %2154 }
0x1411   :  { %v2156_v20 = vmul.f32 0.03125, %v2155_v19 }
0x1413   :  { %v2157_v22 = vsub.f32 %v2149_v18, %v2156_v20 }
0x1415   :  { %v2158_v23 = vmul.f32 %v3551_v34, %v2157_v22 }
0x1417   :  { %v2159_v50 = vmul.f32 %v2158_v23, %v2158_v23 }
0x1419   :  { %2160 = vadd.xlane.f32.xlu0 %v2159_v50 }
0x14a6   :  { %v2161_v24 = vpop.xlane.xlu0 %2160 }
0x14a7   :  { %v2162_v25 = vmul.f32 0.03125, %v2161_v24 }
0x14a9   :  { %v2163_v26 = vadd.f32 1e-05, %v2162_v25 }
0x14ab   :  { %2800 = vrsqrt.f32 %v2163_v26 }
0x14b5   :  { %v2801_v27 = vpop.eup %2800 }
0x14b6   :  { %v2165_v30 = vmul.f32 %v2801_v27, %v2158_v23 }
0x14b8   :  { %v2172_v32 = vmul.f32 %v2303_v29, %v2165_v30 }
0x14ba   :  { %v2179_v36 = vadd.f32 %v2304_v31, %v2172_v32 }
0x14bc   :  { %2180 = vst [vmem:[%s3764_s15] sm:$0xff] %v2179_v36 }
0x14bd   :  { %2185 = vsyncpa [#allocation3], 1 }
0x14be   :  { %2186 = vsyncpa [#allocation5], 1 }
0x14bf   :  { %2187 = vsyncpa [#allocation8], 1 }
0x14c0   :  { %2188 = vsyncpa [#allocation11], 1 }
0x14c1   :  { %2189 = vsyncpa [#allocation14], 1 }
0x14c2   :  { %2190 = vsyncpa [#allocation17], 1 }
0x14c3   :  { %2191 = vsyncpa [#allocation20], 1 }

</bundles_post_ra>
